<compile_context>
chip_gen: v6e
topology: v6e:2x2x1
jax: 0.10.0
libtpu: 0.0.40
codegen_flags: <defaults>
</compile_context>

<pallas_src>
import math
from functools import partial

import jax
import jax.numpy as jnp
from jax import lax
from jax.experimental import pallas as pl
from jax.experimental.pallas import tpu as pltpu

_MASK_VALUE = -0.7 * float(jnp.finfo(jnp.float32).max)   # finite mask value (NaN-safe)
_GELU_C = 0.7978845608028654                             # sqrt(2 / pi)

# Single-buffering for constant-index (resident) weight specs saves VMEM
# (important on v7x's 64 MiB).  Falls back to default double-buffering if this
# JAX/Mosaic version rejects pipeline_mode=pl.Buffered(1).
_WEIGHT_SINGLE_BUFFER = [True]


def _weight_spec(block_shape, index_map):
    if _WEIGHT_SINGLE_BUFFER[0]:
        try:
            return pl.BlockSpec(block_shape, index_map, pipeline_mode=pl.Buffered(1))
        except Exception:
            _WEIGHT_SINGLE_BUFFER[0] = False
    return pl.BlockSpec(block_shape, index_map)


def _chip_defaults():
    """Per-generation defaults: target sequence tile and VMEM limit."""
    vmem = 128 * 1024 * 1024
    seq_tile = 128                                # v5e: 4x128 MXU -> 128 tiles
    try:
        info = pltpu.get_tpu_info()
        vmem = int(getattr(info, "vmem_capacity_bytes", vmem))
        name = (str(getattr(info, "chip_version", "")) +
                str(getattr(info, "device_kind", ""))).lower()
        if any(t in name for t in ("v6", "v7", "trillium")):
            seq_tile = 256                        # 2x256 MXU -> 256-row tiles fill it
    except Exception:
        pass
    # v5e/v6e (128 MiB VMEM) -> ~96 MiB cap; v7x (64 MiB) -> 48 MiB cap.
    vmem_limit = int(min(vmem * 3 // 4, 100 * 1024 * 1024))
    return seq_tile, vmem_limit


def _pick_seq_tile(s, target):
    if s <= target:
        return s
    t = target
    while t >= 128:
        if s % t == 0:
            return t
        t -= 128
    return s


def _pick_ff_tile(hff, target=512):
    if hff <= target:
        return hff
    t = target
    while t >= 128:
        if hff % t == 0:
            return t
        t -= 128
    return hff


def _layer_norm_f32(x, gamma, beta, eps):
    mu = jnp.mean(x, axis=-1, keepdims=True)
    var = jnp.mean((x - mu) ** 2, axis=-1, keepdims=True)
    return (x - mu) * lax.rsqrt(var + eps) * gamma + beta


# ----------------- Kernel 1: LayerNorm1 + fused QKV projection -----------------
def _ln_qkv_kernel(x_ref, g_ref, b_ref, wqkv_ref, bqkv_ref,
                   q_ref, k_ref, v_ref, *, num_heads, eps):
    x = x_ref[0].astype(jnp.float32)                       # (Ts, H)
    T, H = x.shape
    hd = H // num_heads
    xn = _layer_norm_f32(x, g_ref[...], b_ref[...], eps)
    # Single fused MXU pass: (Ts, H) @ (H, 3H), bf16 inputs, f32 accumulation.
    # sm_scale is already folded into the Q third of the weight/bias.
    qkv = jnp.dot(xn.astype(jnp.bfloat16), wqkv_ref[...],
                  preferred_element_type=jnp.float32) + bqkv_ref[...]

    def heads(m):                                          # (Ts, H) -> (nh, Ts, hd)
        return m.reshape(T, num_heads, hd).transpose(1, 0, 2)

    # TODO(synk): head-major stores have lane dim hd (<128 for small heads) ->
    # masked vst; a lane-dense packed (B,S,3H) output would fix the store but
    # pushes the per-head relayout into K2's inner kv loop (more total XLU work).
    q_ref[0] = heads(qkv[:, :H]).astype(q_ref.dtype)
    k_ref[0] = heads(qkv[:, H:2 * H]).astype(k_ref.dtype)
    v_ref[0] = heads(qkv[:, 2 * H:]).astype(v_ref.dtype)


def _ln_qkv(x, ln_g, ln_b, w_qkv_t, b_qkv, *, num_heads, block_s, eps, vmem_limit):
    B, S, H = x.shape
    hd = H // num_heads
    n_s = S // block_s
    qkv_sds = jax.ShapeDtypeStruct((B, num_heads, S, hd), jnp.bfloat16)
    head_spec = pl.BlockSpec((1, num_heads, block_s, hd), lambda b, s: (b, 0, s, 0))
    cost = pl.CostEstimate(
        flops=2 * B * S * H * 3 * H,
        transcendentals=B * S,
        bytes_accessed=4 * B * S * H + 2 * H * 3 * H + 3 * 2 * B * S * H)
    return pl.pallas_call(
        partial(_ln_qkv_kernel, num_heads=num_heads, eps=eps),
        out_shape=(qkv_sds, qkv_sds, qkv_sds),
        grid_spec=pltpu.PrefetchScalarGridSpec(
            num_scalar_prefetch=0,
            grid=(B, n_s),
            in_specs=[
                pl.BlockSpec((1, block_s, H), lambda b, s: (b, s, 0)),
                pl.BlockSpec((1, H), lambda b, s: (0, 0)),
                pl.BlockSpec((1, H), lambda b, s: (0, 0)),
                _weight_spec((H, 3 * H), lambda b, s: (0, 0)),     # resident, 1-buffered
                pl.BlockSpec((1, 3 * H), lambda b, s: (0, 0)),
            ],
            out_specs=(head_spec, head_spec, head_spec),
        ),
        compiler_params=pltpu.CompilerParams(
            dimension_semantics=("parallel", "parallel"),
            vmem_limit_bytes=vmem_limit),
        cost_estimate=cost,
    )(x, ln_g, ln_b, w_qkv_t, b_qkv)


# -------- Kernel 2: flash attention + output projection + residual add ---------
def _flash_attn_kernel(x_ref, q_ref, k_ref, v_ref, wo_ref, bo_ref, o_ref,
                       m_sc, l_sc, acc_sc, *, block_q, block_k):
    qi = pl.program_id(1)
    ki = pl.program_id(2)
    nk = pl.num_programs(2)

    @pl.when(ki == 0)
    def _init():
        m_sc[...] = jnp.full(m_sc.shape, _MASK_VALUE, jnp.float32)
        l_sc[...] = jnp.zeros(l_sc.shape, jnp.float32)
        acc_sc[...] = jnp.zeros(acc_sc.shape, jnp.float32)

    q_start = qi * block_q
    k_start = ki * block_k
    q_last = q_start + block_q - 1
    k_last = k_start + block_k - 1

    def _step(apply_mask):
        q = q_ref[0]                                      # (nh, Tq, hd) bf16 (pre-scaled)
        k = k_ref[0]                                      # (nh, Tk, hd) bf16
        v = v_ref[0]
        s = jnp.einsum('hqd,hkd->hqk', q, k, preferred_element_type=jnp.float32)
        if apply_mask:
            rows = q_start + lax.broadcasted_iota(jnp.int32, (block_q, block_k), 0)
            cols = k_start + lax.broadcasted_iota(jnp.int32, (block_q, block_k), 1)
            s = jnp.where((cols <= rows)[None, :, :], s, _MASK_VALUE)
        m_prev = m_sc[...]
        m_new = jnp.maximum(m_prev, jnp.max(s, axis=-1, keepdims=True))
        alpha = jnp.exp(m_prev - m_new)
        p = jnp.exp(s - m_new)
        l_sc[...] = alpha * l_sc[...] + jnp.sum(p, axis=-1, keepdims=True)
        acc_sc[...] = alpha * acc_sc[...] + jnp.einsum(
            'hqk,hkd->hqd', p.astype(v.dtype), v, preferred_element_type=jnp.float32)
        m_sc[...] = m_new

    # Only diagonal-straddling tiles pay the iota/compare/select mask cost;
    # fully-below-diagonal tiles skip it; above-diagonal tiles do nothing (and
    # their K/V blocks were never fetched thanks to the saturating index_map).
    @pl.when(jnp.logical_and(k_start <= q_last, k_last > q_start))
    def _masked():
        _step(True)

    @pl.when(k_last <= q_start)
    def _unmasked():
        _step(False)

    @pl.when(ki == nk - 1)
    def _finalize():
        # One reciprocal per (head, q-row), on the EUP slot.
        ctx = acc_sc[...] * pl.reciprocal(l_sc[...], approx=True)   # (nh, Tq, hd)
        nh, T, hd = ctx.shape
        # TODO(synk): this f32 relayout is per-q-tile XLU epilogue work; a
        # per-head-blocked Wo layout could remove it if it shows on the crit path.
        ctx2d = ctx.transpose(1, 0, 2).reshape(T, nh * hd)          # merge heads -> (Tq, H)
        proj = jnp.dot(ctx2d.astype(jnp.bfloat16), wo_ref[...],
                       preferred_element_type=jnp.float32) + bo_ref[...]
        o_ref[0] = (x_ref[0].astype(jnp.float32) + proj).astype(o_ref.dtype)


def _attn_residual(x, q, k, v, wo_t, bo, *, block_q, block_k, vmem_limit):
    B, S, H = x.shape
    _, nh, _, hd = q.shape
    nq = S // block_q
    nk = S // block_k

    def kv_map(b, qi, ki):
        # Saturate at the diagonal: kv tiles strictly above it map to the same
        # block index as the previous step, so the pipeline never fetches them
        # (compute for those steps is skipped in the kernel).  ~2x less K/V DMA.
        last_needed = ((qi + 1) * block_q - 1) // block_k
        return (b, 0, jnp.minimum(ki, last_needed), 0)

    cost = pl.CostEstimate(
        flops=2 * B * nh * S * S * hd + 2 * B * S * H * H,
        transcendentals=B * nh * S * S // 2,
        bytes_accessed=3 * 2 * B * nh * S * hd + 2 * 4 * B * S * H + 2 * H * H)
    return pl.pallas_call(
        partial(_flash_attn_kernel, block_q=block_q, block_k=block_k),
        # TODO(synk): on v5e, emitting x2 in bf16 (or fusing K2+K3) would cut
        # HBM traffic further; kept f32 to preserve residual precision.
        out_shape=jax.ShapeDtypeStruct((B, S, H), jnp.float32),
        grid_spec=pltpu.PrefetchScalarGridSpec(
            num_scalar_prefetch=0,
            grid=(B, nq, nk),
            in_specs=[
                pl.BlockSpec((1, block_q, H), lambda b, qi, ki: (b, qi, 0)),          # residual x
                pl.BlockSpec((1, nh, block_q, hd), lambda b, qi, ki: (b, 0, qi, 0)),  # q
                pl.BlockSpec((1, nh, block_k, hd), kv_map),                           # k
                pl.BlockSpec((1, nh, block_k, hd), kv_map),                           # v
                _weight_spec((H, H), lambda b, qi, ki: (0, 0)),                       # Wo^T resident
                pl.BlockSpec((1, H), lambda b, qi, ki: (0, 0)),                       # bo
            ],
            out_specs=pl.BlockSpec((1, block_q, H), lambda b, qi, ki: (b, qi, 0)),
            scratch_shapes=[
                pltpu.VMEM((nh, block_q, 1), jnp.float32),    # running max
                pltpu.VMEM((nh, block_q, 1), jnp.float32),    # running denom
                pltpu.VMEM((nh, block_q, hd), jnp.float32),   # running P@V accumulator
            ],
        ),
        compiler_params=pltpu.CompilerParams(
            dimension_semantics=("parallel", "parallel", "arbitrary"),
            vmem_limit_bytes=vmem_limit),
        cost_estimate=cost,
    )(x, q, k, v, wo_t, bo)


# ------------- Kernel 3: LayerNorm2 + MLP (Hff-tiled) + residual ---------------
def _ln_mlp_kernel(x_ref, g_ref, b_ref, w1_ref, b1_ref, w2_ref, b2_ref, o_ref,
                   xn_sc, acc_sc, *, eps):
    fi = pl.program_id(2)
    nf = pl.num_programs(2)

    @pl.when(fi == 0)
    def _init():
        x = x_ref[0].astype(jnp.float32)
        xn = _layer_norm_f32(x, g_ref[...], b_ref[...], eps)
        xn_sc[...] = xn.astype(jnp.bfloat16)
        acc_sc[...] = jnp.zeros(acc_sc.shape, jnp.float32)

    h = jnp.dot(xn_sc[...], w1_ref[...],
                preferred_element_type=jnp.float32) + b1_ref[...]
    # TODO(synk): PyTorch nn.GELU default is exact (erf); tanh approximation used
    # here (EUP-friendly tanh), max abs difference < 3e-3.
    h = 0.5 * h * (1.0 + jnp.tanh(_GELU_C * (h + 0.044715 * h * h * h)))
    acc_sc[...] += jnp.dot(h.astype(jnp.bfloat16), w2_ref[...],
                           preferred_element_type=jnp.float32)

    @pl.when(fi == nf - 1)
    def _finalize():
        x = x_ref[0].astype(jnp.float32)
        o_ref[0] = (x + acc_sc[...] + b2_ref[...]).astype(o_ref.dtype)


def _ln_mlp_residual(x, ln_g, ln_b, w1_t, b1, w2_t, b2, *, block_s, block_ff,
                     eps, vmem_limit):
    B, S, H = x.shape
    Hff = w1_t.shape[1]
    n_s = S // block_s
    n_ff = Hff // block_ff
    # If the whole weight fits (n_ff == 1) keep it resident and single-buffered;
    # otherwise stream ff chunks with default double-buffering to overlap DMA.
    w_spec = _weight_spec if n_ff == 1 else pl.BlockSpec
    cost = pl.CostEstimate(
        flops=4 * B * S * H * Hff,
        transcendentals=B * S * Hff,
        bytes_accessed=2 * 4 * B * S * H + 2 * 2 * H * Hff)
    return pl.pallas_call(
        partial(_ln_mlp_kernel, eps=eps),
        out_shape=jax.ShapeDtypeStruct((B, S, H), jnp.float32),
        grid_spec=pltpu.PrefetchScalarGridSpec(
            num_scalar_prefetch=0,
            grid=(B, n_s, n_ff),
            in_specs=[
                pl.BlockSpec((1, block_s, H), lambda b, s, f: (b, s, 0)),
                pl.BlockSpec((1, H), lambda b, s, f: (0, 0)),
                pl.BlockSpec((1, H), lambda b, s, f: (0, 0)),
                w_spec((H, block_ff), lambda b, s, f: (0, f)),       # w1 (streamed over ff)
                pl.BlockSpec((1, block_ff), lambda b, s, f: (0, f)), # b1 chunk
                w_spec((block_ff, H), lambda b, s, f: (f, 0)),       # w2 (streamed over ff)
                pl.BlockSpec((1, H), lambda b, s, f: (0, 0)),        # b2
            ],
            out_specs=pl.BlockSpec((1, block_s, H), lambda b, s, f: (b, s, 0)),
            scratch_shapes=[
                pltpu.VMEM((block_s, H), jnp.bfloat16),   # LN2(x), reused across ff steps
                pltpu.VMEM((block_s, H), jnp.float32),    # MLP output accumulator
            ],
        ),
        compiler_params=pltpu.CompilerParams(
            dimension_semantics=("parallel", "parallel", "arbitrary"),
            vmem_limit_bytes=vmem_limit),
        cost_estimate=cost,
    )(x, ln_g, ln_b, w1_t, b1, w2_t, b2)


# --------------------------------- wrapper -------------------------------------
def transformer_block(x, params, num_heads, *, eps=1e-5,
                      block_q=None, block_k=None, block_ff=None):
    """x: (B, S, H) f32.  params: PyTorch-style parameter dict (see __main__)."""
    B, S, H = x.shape
    assert H % num_heads == 0
    hd = H // num_heads
    bf16, f32 = jnp.bfloat16, jnp.float32
    sm_scale = 1.0 / math.sqrt(hd)

    seq_tile, vmem_limit = _chip_defaults()
    if block_q is None:
        block_q = _pick_seq_tile(S, seq_tile)
    if block_k is None:
        block_k = _pick_seq_tile(S, seq_tile)
    assert S % block_q == 0 and S % block_k == 0

    Hff = params["w1"].shape[0]
    if block_ff is None:
        # Keep w1/w2 resident when they comfortably fit the VMEM budget
        # (weights read once total); otherwise tile the hidden dim (v7x: 64 MiB).
        if 2 * 2 * H * Hff <= vmem_limit // 2:
            block_ff = Hff
        else:
            block_ff = _pick_ff_tile(Hff)

    # Pack / pre-transpose / cast weights once (layout plumbing outside kernels).
    # sm_scale is folded into the Q projection so K2 never multiplies by it.
    w_qkv_t = jnp.concatenate(
        [params["wq"] * sm_scale, params["wk"], params["wv"]], axis=0).T.astype(bf16)
    b_qkv = jnp.concatenate(
        [params["bq"] * sm_scale, params["bk"], params["bv"]],
        axis=-1).reshape(1, 3 * H).astype(f32)
    wo_t = params["wo"].T.astype(bf16)                                         # (H, H)
    bo = params["bo"].reshape(1, H).astype(f32)
    w1_t = params["w1"].T.astype(bf16)                                         # (H, 4H)
    b1 = params["b1"].reshape(1, -1).astype(f32)
    w2_t = params["w2"].T.astype(bf16)                                         # (4H, H)
    b2 = params["b2"].reshape(1, H).astype(f32)
    ln1_g = params["ln1_g"].reshape(1, H).astype(f32)
    ln1_b = params["ln1_b"].reshape(1, H).astype(f32)
    ln2_g = params["ln2_g"].reshape(1, H).astype(f32)
    ln2_b = params["ln2_b"].reshape(1, H).astype(f32)

    def _forward():
        q, k, v = _ln_qkv(x, ln1_g, ln1_b, w_qkv_t, b_qkv,
                          num_heads=num_heads, block_s=block_q, eps=eps,
                          vmem_limit=vmem_limit)
        x2 = _attn_residual(x, q, k, v, wo_t, bo,
                            block_q=block_q, block_k=block_k,
                            vmem_limit=vmem_limit)
        return _ln_mlp_residual(x2, ln2_g, ln2_b, w1_t, b1, w2_t, b2,
                                block_s=block_q, block_ff=block_ff, eps=eps,
                                vmem_limit=vmem_limit)

    try:
        return _forward()
    except Exception:
        # Retry once without single-buffered weight specs in case this
        # JAX/Mosaic version rejects pl.Buffered(1).
        if _WEIGHT_SINGLE_BUFFER[0]:
            _WEIGHT_SINGLE_BUFFER[0] = False
            return _forward()
        raise


# -------------------------------- references -----------------------------------
def _reference_matched(x, params, num_heads, eps=1e-5):
    """Mirrors the kernels' numerics: bf16 matmul inputs, f32 accumulation,
    finite mask value, tanh GELU."""
    bf16, f32 = jnp.bfloat16, jnp.float32
    B, S, H = x.shape
    hd = H // num_heads

    def ln(v, g, b):
        mu = jnp.mean(v, -1, keepdims=True)
        var = jnp.mean((v - mu) ** 2, -1, keepdims=True)
        return (v - mu) * lax.rsqrt(var + eps) * g + b

    w_qkv_t = jnp.concatenate([params["wq"], params["wk"], params["wv"]], 0).T.astype(bf16)
    b_qkv = jnp.concatenate([params["bq"], params["bk"], params["bv"]], -1)
    xn = ln(x, params["ln1_g"], params["ln1_b"])
    qkv = jnp.einsum('bsh,hk->bsk', xn.astype(bf16), w_qkv_t,
                     preferred_element_type=f32) + b_qkv
    def heads(m):
        return m.astype(bf16).reshape(B, S, num_heads, hd).transpose(0, 2, 1, 3)
    q, k, v = heads(qkv[..., :H]), heads(qkv[..., H:2 * H]), heads(qkv[..., 2 * H:])
    s = jnp.einsum('bhqd,bhkd->bhqk', q, k,
                   preferred_element_type=f32) * (1.0 / math.sqrt(hd))
    causal = jnp.tril(jnp.ones((S, S), dtype=jnp.bool_))[None, None]
    s = jnp.where(causal, s, _MASK_VALUE)
    m = jnp.max(s, -1, keepdims=True)
    p = jnp.exp(s - m)
    l = jnp.sum(p, -1, keepdims=True)
    ctx = jnp.einsum('bhqk,bhkd->bhqd', p.astype(bf16), v,
                     preferred_element_type=f32) / l
    ctx = ctx.transpose(0, 2, 1, 3).reshape(B, S, H)
    attn = jnp.einsum('bsh,hk->bsk', ctx.astype(bf16), params["wo"].T.astype(bf16),
                      preferred_element_type=f32) + params["bo"]
    x2 = x + attn
    xn2 = ln(x2, params["ln2_g"], params["ln2_b"])
    h = jnp.einsum('bsh,hk->bsk', xn2.astype(bf16), params["w1"].T.astype(bf16),
                   preferred_element_type=f32) + params["b1"]
    h = 0.5 * h * (1.0 + jnp.tanh(_GELU_C * (h + 0.044715 * h ** 3)))
    out = jnp.einsum('bsh,hk->bsk', h.astype(bf16), params["w2"].T.astype(bf16),
                     preferred_element_type=f32) + params["b2"]
    return x2 + out


def _reference_f32(x, params, num_heads, eps=1e-5):
    """Plain f32 reference matching the PyTorch module (exact erf GELU)."""
    B, S, H = x.shape
    hd = H // num_heads

    def ln(v, g, b):
        mu = jnp.mean(v, -1, keepdims=True)
        var = jnp.mean((v - mu) ** 2, -1, keepdims=True)
        return (v - mu) / jnp.sqrt(var + eps) * g + b

    def lin(v, w, b):
        return jnp.einsum('bsh,oh->bso', v, w) + b

    xn = ln(x, params["ln1_g"], params["ln1_b"])
    def heads(m):
        return m.reshape(B, S, num_heads, hd).transpose(0, 2, 1, 3)
    q = heads(lin(xn, params["wq"], params["bq"]))
    k = heads(lin(xn, params["wk"], params["bk"]))
    v = heads(lin(xn, params["wv"], params["bv"]))
    s = jnp.einsum('bhqd,bhkd->bhqk', q, k) / math.sqrt(hd)
    causal = jnp.tril(jnp.ones((S, S), dtype=jnp.bool_))[None, None]
    s = jnp.where(causal, s, -jnp.inf)
    p = jax.nn.softmax(s, -1)
    ctx = jnp.einsum('bhqk,bhkd->bhqd', p, v).transpose(0, 2, 1, 3).reshape(B, S, H)
    x2 = x + lin(ctx, params["wo"], params["bo"])
    xn2 = ln(x2, params["ln2_g"], params["ln2_b"])
    h = lin(xn2, params["w1"], params["b1"])
    h = 0.5 * h * (1.0 + jax.scipy.special.erf(h / math.sqrt(2.0)))
    return x2 + lin(h, params["w2"], params["b2"])


if __name__ == "__main__":
    B, S, H = 2, 8, 32
    NUM_HEADS = 8

    key = jax.random.PRNGKey(0)
    ks = jax.random.split(key, 13)
    b_h = 1.0 / math.sqrt(H)
    b_4h = 1.0 / math.sqrt(4 * H)

    def u(k, shape, bound):
        return jax.random.uniform(k, shape, jnp.float32, -bound, bound)

    params = {
        "ln1_g": jnp.ones((H,), jnp.float32), "ln1_b": jnp.zeros((H,), jnp.float32),
        "ln2_g": jnp.ones((H,), jnp.float32), "ln2_b": jnp.zeros((H,), jnp.float32),
        "wq": u(ks[0], (H, H), b_h), "bq": u(ks[1], (H,), b_h),
        "wk": u(ks[2], (H, H), b_h), "bk": u(ks[3], (H,), b_h),
        "wv": u(ks[4], (H, H), b_h), "bv": u(ks[5], (H,), b_h),
        "wo": u(ks[6], (H, H), b_h), "bo": u(ks[7], (H,), b_h),
        "w1": u(ks[8], (4 * H, H), b_h), "b1": u(ks[9], (4 * H,), b_h),
        "w2": u(ks[10], (H, 4 * H), b_4h), "b2": u(ks[11], (H,), b_4h),
    }
    x = jax.random.normal(ks[12], (B, S, H), jnp.float32)

    out = transformer_block(x, params, NUM_HEADS)
    out = jax.block_until_ready(out)
    assert out.shape == (B, S, H)

    ref_m = _reference_matched(x, params, NUM_HEADS)
    ref_e = _reference_f32(x, params, NUM_HEADS)
    assert jnp.allclose(out, ref_m, atol=2e-2, rtol=2e-2), (
        "mismatch vs numerics-matched reference: "
        f"max abs diff = {float(jnp.max(jnp.abs(out - ref_m)))}")
    assert jnp.allclose(out, ref_e, atol=8e-2, rtol=8e-2), (
        "mismatch vs exact f32 reference: "
        f"max abs diff = {float(jnp.max(jnp.abs(out - ref_e)))}")

    print("KERNEL_OK")
</pallas_src>

<mosaic_0001>
module attributes {stable_mosaic.version = 11 : i64} {
  func.func @_ln_qkv_kernel(%arg0: i32, %arg1: i32, %arg2: memref<1x8x32xf32, #tpu.memory_space<vmem>>, %arg3: memref<1x32xf32, #tpu.memory_space<vmem>>, %arg4: memref<1x32xf32, #tpu.memory_space<vmem>>, %arg5: memref<32x96xbf16, #tpu.memory_space<vmem>>, %arg6: memref<1x96xf32, #tpu.memory_space<vmem>>, %arg7: memref<1x8x8x4xbf16, #tpu.memory_space<vmem>>, %arg8: memref<1x8x8x4xbf16, #tpu.memory_space<vmem>>, %arg9: memref<1x8x8x4xbf16, #tpu.memory_space<vmem>>) attributes {dimension_semantics = [#tpu.dimension_semantics<parallel>, #tpu.dimension_semantics<parallel>], iteration_bounds = array<i64: 2, 1>, scalar_prefetch = 0 : i64, scratch_operands = 0 : i64, tpu.core_type = #tpu.core_type<tc>, window_params = [{transform_indices = @transform_0, window_bounds = array<i64: 1, 8, 32>}, {pipeline_mode = #tpu.pipeline_mode<synchronous>, transform_indices = @transform_1, window_bounds = array<i64: 1, 32>}, {pipeline_mode = #tpu.pipeline_mode<synchronous>, transform_indices = @transform_2, window_bounds = array<i64: 1, 32>}, {pipeline_mode = #tpu.pipeline_mode<synchronous>, transform_indices = @transform_3, window_bounds = array<i64: 32, 96>}, {pipeline_mode = #tpu.pipeline_mode<synchronous>, transform_indices = @transform_4, window_bounds = array<i64: 1, 96>}, {transform_indices = @transform_5, window_bounds = array<i64: 1, 8, 8, 4>}, {transform_indices = @transform_6, window_bounds = array<i64: 1, 8, 8, 4>}, {transform_indices = @transform_7, window_bounds = array<i64: 1, 8, 8, 4>}]} {
    %c0 = arith.constant 0 : index
    %c0_0 = arith.constant 0 : index
    %c0_1 = arith.constant 0 : index
    %0 = vector.load %arg2[%c0, %c0_0, %c0_1] : memref<1x8x32xf32, #tpu.memory_space<vmem>>, vector<1x8x32xf32>
    %1 = vector.shape_cast %0 : vector<1x8x32xf32> to vector<8x32xf32>
    %c0_2 = arith.constant 0 : index
    %c0_3 = arith.constant 0 : index
    %2 = vector.load %arg3[%c0_2, %c0_3] : memref<1x32xf32, #tpu.memory_space<vmem>>, vector<1x32xf32>
    %c0_4 = arith.constant 0 : index
    %c0_5 = arith.constant 0 : index
    %3 = vector.load %arg4[%c0_4, %c0_5] : memref<1x32xf32, #tpu.memory_space<vmem>>, vector<1x32xf32>
    %cst = arith.constant dense<0.000000e+00> : vector<8xf32>
    %4 = vector.multi_reduction <add>, %1, %cst [1] : vector<8x32xf32> to vector<8xf32>
    %5 = vector.shape_cast %4 : vector<8xf32> to vector<8x1xf32>
    %cst_6 = arith.constant 3.200000e+01 : f32
    %6 = vector.broadcast %cst_6 : f32 to vector<8x1xf32>
    %7 = arith.divf %5, %6 : vector<8x1xf32>
    %8 = vector.broadcast %7 : vector<8x1xf32> to vector<8x32xf32>
    %9 = arith.subf %1, %8 : vector<8x32xf32>
    %10 = arith.mulf %9, %9 : vector<8x32xf32>
    %cst_7 = arith.constant dense<0.000000e+00> : vector<8xf32>
    %11 = vector.multi_reduction <add>, %10, %cst_7 [1] : vector<8x32xf32> to vector<8xf32>
    %12 = vector.shape_cast %11 : vector<8xf32> to vector<8x1xf32>
    %cst_8 = arith.constant 3.200000e+01 : f32
    %13 = vector.broadcast %cst_8 : f32 to vector<8x1xf32>
    %14 = arith.divf %12, %13 : vector<8x1xf32>
    %15 = vector.broadcast %7 : vector<8x1xf32> to vector<8x32xf32>
    %16 = arith.subf %1, %15 : vector<8x32xf32>
    %cst_9 = arith.constant 9.99999974E-6 : f32
    %17 = vector.broadcast %cst_9 : f32 to vector<8x1xf32>
    %18 = arith.addf %14, %17 : vector<8x1xf32>
    %19 = math.rsqrt %18 : vector<8x1xf32>
    %20 = vector.broadcast %19 : vector<8x1xf32> to vector<8x32xf32>
    %21 = arith.mulf %16, %20 : vector<8x32xf32>
    %22 = vector.broadcast %2 : vector<1x32xf32> to vector<8x32xf32>
    %23 = arith.mulf %21, %22 : vector<8x32xf32>
    %24 = vector.broadcast %3 : vector<1x32xf32> to vector<8x32xf32>
    %25 = arith.addf %23, %24 : vector<8x32xf32>
    %26 = arith.truncf %25 : vector<8x32xf32> to vector<8x32xbf16>
    %c0_10 = arith.constant 0 : index
    %c0_11 = arith.constant 0 : index
    %27 = vector.load %arg5[%c0_10, %c0_11] : memref<32x96xbf16, #tpu.memory_space<vmem>>, vector<32x96xbf16>
    %cst_12 = arith.constant dense<0.000000e+00> : vector<8x96xf32>
    %28 = tpu.matmul %26, %27, %cst_12 {dimension_numbers = #tpu.dot_dimension_numbers<[1], [0], [0], [1], [0, 0, 1, 1], [], []>} : vector<8x32xbf16>, vector<32x96xbf16>, vector<8x96xf32> -> vector<8x96xf32>
    %c0_13 = arith.constant 0 : index
    %c0_14 = arith.constant 0 : index
    %29 = vector.load %arg6[%c0_13, %c0_14] : memref<1x96xf32, #tpu.memory_space<vmem>>, vector<1x96xf32>
    %30 = vector.broadcast %29 : vector<1x96xf32> to vector<8x96xf32>
    %31 = arith.addf %28, %30 : vector<8x96xf32>
    %32 = vector.extract_strided_slice %31 {offsets = [0, 0], sizes = [8, 32], strides = [1, 1]} : vector<8x96xf32> to vector<8x32xf32>
    %33 = vector.shape_cast %32 : vector<8x32xf32> to vector<8x8x4xf32>
    %34 = tpu.transpose %33, [1, 0, 2] : vector<8x8x4xf32> -> vector<8x8x4xf32>
    %35 = arith.truncf %34 : vector<8x8x4xf32> to vector<8x8x4xbf16>
    %c0_15 = arith.constant 0 : index
    %c0_16 = arith.constant 0 : index
    %c0_17 = arith.constant 0 : index
    %c0_18 = arith.constant 0 : index
    %36 = vector.load %arg7[%c0_15, %c0_16, %c0_17, %c0_18] : memref<1x8x8x4xbf16, #tpu.memory_space<vmem>>, vector<1x8x8x4xbf16>
    %37 = vector.shape_cast %36 : vector<1x8x8x4xbf16> to vector<8x8x4xbf16>
    %38 = vector.shape_cast %35 : vector<8x8x4xbf16> to vector<1x8x8x4xbf16>
    tpu.vector_store %arg7[%c0_15, %c0_16, %c0_17, %c0_18], %38 {strides = array<i32>} : memref<1x8x8x4xbf16, #tpu.memory_space<vmem>>, vector<1x8x8x4xbf16>,
    %39 = vector.extract_strided_slice %31 {offsets = [0, 32], sizes = [8, 32], strides = [1, 1]} : vector<8x96xf32> to vector<8x32xf32>
    %40 = vector.shape_cast %39 : vector<8x32xf32> to vector<8x8x4xf32>
    %41 = tpu.transpose %40, [1, 0, 2] : vector<8x8x4xf32> -> vector<8x8x4xf32>
    %42 = arith.truncf %41 : vector<8x8x4xf32> to vector<8x8x4xbf16>
    %c0_19 = arith.constant 0 : index
    %c0_20 = arith.constant 0 : index
    %c0_21 = arith.constant 0 : index
    %c0_22 = arith.constant 0 : index
    %43 = vector.load %arg8[%c0_19, %c0_20, %c0_21, %c0_22] : memref<1x8x8x4xbf16, #tpu.memory_space<vmem>>, vector<1x8x8x4xbf16>
    %44 = vector.shape_cast %43 : vector<1x8x8x4xbf16> to vector<8x8x4xbf16>
    %45 = vector.shape_cast %42 : vector<8x8x4xbf16> to vector<1x8x8x4xbf16>
    tpu.vector_store %arg8[%c0_19, %c0_20, %c0_21, %c0_22], %45 {strides = array<i32>} : memref<1x8x8x4xbf16, #tpu.memory_space<vmem>>, vector<1x8x8x4xbf16>,
    %46 = vector.extract_strided_slice %31 {offsets = [0, 64], sizes = [8, 32], strides = [1, 1]} : vector<8x96xf32> to vector<8x32xf32>
    %47 = vector.shape_cast %46 : vector<8x32xf32> to vector<8x8x4xf32>
    %48 = tpu.transpose %47, [1, 0, 2] : vector<8x8x4xf32> -> vector<8x8x4xf32>
    %49 = arith.truncf %48 : vector<8x8x4xf32> to vector<8x8x4xbf16>
    %c0_23 = arith.constant 0 : index
    %c0_24 = arith.constant 0 : index
    %c0_25 = arith.constant 0 : index
    %c0_26 = arith.constant 0 : index
    %50 = vector.load %arg9[%c0_23, %c0_24, %c0_25, %c0_26] : memref<1x8x8x4xbf16, #tpu.memory_space<vmem>>, vector<1x8x8x4xbf16>
    %51 = vector.shape_cast %50 : vector<1x8x8x4xbf16> to vector<8x8x4xbf16>
    %52 = vector.shape_cast %49 : vector<8x8x4xbf16> to vector<1x8x8x4xbf16>
    tpu.vector_store %arg9[%c0_23, %c0_24, %c0_25, %c0_26], %52 {strides = array<i32>} : memref<1x8x8x4xbf16, #tpu.memory_space<vmem>>, vector<1x8x8x4xbf16>,
    return
  }
  func.func @transform_0(%arg0: i32, %arg1: i32) -> (i32, i32, i32) {
    %c0_i32 = arith.constant 0 : i32
    %c0_i32_0 = arith.constant 0 : i32
    return %arg0, %arg1, %c0_i32 : i32, i32, i32
  }
  func.func @transform_1(%arg0: i32, %arg1: i32) -> (i32, i32) {
    %c0_i32 = arith.constant 0 : i32
    %c0_i32_0 = arith.constant 0 : i32
    %c0_i32_1 = arith.constant 0 : i32
    return %c0_i32, %c0_i32_0 : i32, i32
  }
  func.func @transform_2(%arg0: i32, %arg1: i32) -> (i32, i32) {
    %c0_i32 = arith.constant 0 : i32
    %c0_i32_0 = arith.constant 0 : i32
    %c0_i32_1 = arith.constant 0 : i32
    return %c0_i32, %c0_i32_0 : i32, i32
  }
  func.func @transform_3(%arg0: i32, %arg1: i32) -> (i32, i32) {
    %c0_i32 = arith.constant 0 : i32
    %c0_i32_0 = arith.constant 0 : i32
    %c0_i32_1 = arith.constant 0 : i32
    return %c0_i32, %c0_i32_0 : i32, i32
  }
  func.func @transform_4(%arg0: i32, %arg1: i32) -> (i32, i32) {
    %c0_i32 = arith.constant 0 : i32
    %c0_i32_0 = arith.constant 0 : i32
    %c0_i32_1 = arith.constant 0 : i32
    return %c0_i32, %c0_i32_0 : i32, i32
  }
  func.func @transform_5(%arg0: i32, %arg1: i32) -> (i32, i32, i32, i32) {
    %c0_i32 = arith.constant 0 : i32
    %c0_i32_0 = arith.constant 0 : i32
    %c0_i32_1 = arith.constant 0 : i32
    return %arg0, %c0_i32, %arg1, %c0_i32_0 : i32, i32, i32, i32
  }
  func.func @transform_6(%arg0: i32, %arg1: i32) -> (i32, i32, i32, i32) {
    %c0_i32 = arith.constant 0 : i32
    %c0_i32_0 = arith.constant 0 : i32
    %c0_i32_1 = arith.constant 0 : i32
    return %arg0, %c0_i32, %arg1, %c0_i32_0 : i32, i32, i32, i32
  }
  func.func @transform_7(%arg0: i32, %arg1: i32) -> (i32, i32, i32, i32) {
    %c0_i32 = arith.constant 0 : i32
    %c0_i32_0 = arith.constant 0 : i32
    %c0_i32_1 = arith.constant 0 : i32
    return %arg0, %c0_i32, %arg1, %c0_i32_0 : i32, i32, i32, i32
  }
}

module attributes {stable_mosaic.version = 11 : i64} {
  func.func @_ln_qkv_kernel(%arg0: i32, %arg1: i32, %arg2: memref<1x8x32xf32, #tpu.memory_space<vmem>>, %arg3: memref<1x32xf32, #tpu.memory_space<vmem>>, %arg4: memref<1x32xf32, #tpu.memory_space<vmem>>, %arg5: memref<32x96xbf16, #tpu.memory_space<vmem>>, %arg6: memref<1x96xf32, #tpu.memory_space<vmem>>, %arg7: memref<1x8x8x4xbf16, #tpu.memory_space<vmem>>, %arg8: memref<1x8x8x4xbf16, #tpu.memory_space<vmem>>, %arg9: memref<1x8x8x4xbf16, #tpu.memory_space<vmem>>) attributes {dimension_semantics = [#tpu.dimension_semantics<parallel>, #tpu.dimension_semantics<parallel>], iteration_bounds = array<i64: 2, 1>, scalar_prefetch = 0 : i64, scratch_operands = 0 : i64, tpu.core_type = #tpu.core_type<tc>, window_params = [{transform_indices = @transform_0, window_bounds = array<i64: 1, 8, 32>}, {pipeline_mode = #tpu.pipeline_mode<synchronous>, transform_indices = @transform_1, window_bounds = array<i64: 1, 32>}, {pipeline_mode = #tpu.pipeline_mode<synchronous>, transform_indices = @transform_2, window_bounds = array<i64: 1, 32>}, {pipeline_mode = #tpu.pipeline_mode<synchronous>, transform_indices = @transform_3, window_bounds = array<i64: 32, 96>}, {pipeline_mode = #tpu.pipeline_mode<synchronous>, transform_indices = @transform_4, window_bounds = array<i64: 1, 96>}, {transform_indices = @transform_5, window_bounds = array<i64: 1, 8, 8, 4>}, {transform_indices = @transform_6, window_bounds = array<i64: 1, 8, 8, 4>}, {transform_indices = @transform_7, window_bounds = array<i64: 1, 8, 8, 4>}]} {
    %c0 = arith.constant 0 : index
    %c0_0 = arith.constant 0 : index
    %c0_1 = arith.constant 0 : index
    %0 = vector.load %arg2[%c0, %c0_0, %c0_1] : memref<1x8x32xf32, #tpu.memory_space<vmem>>, vector<1x8x32xf32>
    %1 = vector.shape_cast %0 : vector<1x8x32xf32> to vector<8x32xf32>
    %c0_2 = arith.constant 0 : index
    %c0_3 = arith.constant 0 : index
    %2 = vector.load %arg3[%c0_2, %c0_3] : memref<1x32xf32, #tpu.memory_space<vmem>>, vector<1x32xf32>
    %c0_4 = arith.constant 0 : index
    %c0_5 = arith.constant 0 : index
    %3 = vector.load %arg4[%c0_4, %c0_5] : memref<1x32xf32, #tpu.memory_space<vmem>>, vector<1x32xf32>
    %cst = arith.constant dense<0.000000e+00> : vector<8xf32>
    %4 = vector.multi_reduction <add>, %1, %cst [1] : vector<8x32xf32> to vector<8xf32>
    %5 = vector.shape_cast %4 : vector<8xf32> to vector<8x1xf32>
    %cst_6 = arith.constant 3.200000e+01 : f32
    %6 = vector.broadcast %cst_6 : f32 to vector<8x1xf32>
    %7 = arith.divf %5, %6 : vector<8x1xf32>
    %8 = vector.broadcast %7 : vector<8x1xf32> to vector<8x32xf32>
    %9 = arith.subf %1, %8 : vector<8x32xf32>
    %10 = arith.mulf %9, %9 : vector<8x32xf32>
    %cst_7 = arith.constant dense<0.000000e+00> : vector<8xf32>
    %11 = vector.multi_reduction <add>, %10, %cst_7 [1] : vector<8x32xf32> to vector<8xf32>
    %12 = vector.shape_cast %11 : vector<8xf32> to vector<8x1xf32>
    %cst_8 = arith.constant 3.200000e+01 : f32
    %13 = vector.broadcast %cst_8 : f32 to vector<8x1xf32>
    %14 = arith.divf %12, %13 : vector<8x1xf32>
    %15 = vector.broadcast %7 : vector<8x1xf32> to vector<8x32xf32>
    %16 = arith.subf %1, %15 : vector<8x32xf32>
    %cst_9 = arith.constant 9.99999974E-6 : f32
    %17 = vector.broadcast %cst_9 : f32 to vector<8x1xf32>
    %18 = arith.addf %14, %17 : vector<8x1xf32>
    %19 = math.rsqrt %18 : vector<8x1xf32>
    %20 = vector.broadcast %19 : vector<8x1xf32> to vector<8x32xf32>
    %21 = arith.mulf %16, %20 : vector<8x32xf32>
    %22 = vector.broadcast %2 : vector<1x32xf32> to vector<8x32xf32>
    %23 = arith.mulf %21, %22 : vector<8x32xf32>
    %24 = vector.broadcast %3 : vector<1x32xf32> to vector<8x32xf32>
    %25 = arith.addf %23, %24 : vector<8x32xf32>
    %26 = arith.truncf %25 : vector<8x32xf32> to vector<8x32xbf16>
    %c0_10 = arith.constant 0 : index
    %c0_11 = arith.constant 0 : index
    %27 = vector.load %arg5[%c0_10, %c0_11] : memref<32x96xbf16, #tpu.memory_space<vmem>>, vector<32x96xbf16>
    %cst_12 = arith.constant dense<0.000000e+00> : vector<8x96xf32>
    %28 = tpu.matmul %26, %27, %cst_12 {dimension_numbers = #tpu.dot_dimension_numbers<[1], [0], [0], [1], [0, 0, 1, 1], [], []>} : vector<8x32xbf16>, vector<32x96xbf16>, vector<8x96xf32> -> vector<8x96xf32>
    %c0_13 = arith.constant 0 : index
    %c0_14 = arith.constant 0 : index
    %29 = vector.load %arg6[%c0_13, %c0_14] : memref<1x96xf32, #tpu.memory_space<vmem>>, vector<1x96xf32>
    %30 = vector.broadcast %29 : vector<1x96xf32> to vector<8x96xf32>
    %31 = arith.addf %28, %30 : vector<8x96xf32>
    %32 = vector.extract_strided_slice %31 {offsets = [0, 0], sizes = [8, 32], strides = [1, 1]} : vector<8x96xf32> to vector<8x32xf32>
    %33 = vector.shape_cast %32 : vector<8x32xf32> to vector<8x8x4xf32>
    %34 = tpu.transpose %33, [1, 0, 2] : vector<8x8x4xf32> -> vector<8x8x4xf32>
    %35 = arith.truncf %34 : vector<8x8x4xf32> to vector<8x8x4xbf16>
    %c0_15 = arith.constant 0 : index
    %c0_16 = arith.constant 0 : index
    %c0_17 = arith.constant 0 : index
    %c0_18 = arith.constant 0 : index
    %36 = vector.load %arg7[%c0_15, %c0_16, %c0_17, %c0_18] : memref<1x8x8x4xbf16, #tpu.memory_space<vmem>>, vector<1x8x8x4xbf16>
    %37 = vector.shape_cast %36 : vector<1x8x8x4xbf16> to vector<8x8x4xbf16>
    %38 = vector.shape_cast %35 : vector<8x8x4xbf16> to vector<1x8x8x4xbf16>
    tpu.vector_store %arg7[%c0_15, %c0_16, %c0_17, %c0_18], %38 {strides = array<i32>} : memref<1x8x8x4xbf16, #tpu.memory_space<vmem>>, vector<1x8x8x4xbf16>,
    %39 = vector.extract_strided_slice %31 {offsets = [0, 32], sizes = [8, 32], strides = [1, 1]} : vector<8x96xf32> to vector<8x32xf32>
    %40 = vector.shape_cast %39 : vector<8x32xf32> to vector<8x8x4xf32>
    %41 = tpu.transpose %40, [1, 0, 2] : vector<8x8x4xf32> -> vector<8x8x4xf32>
    %42 = arith.truncf %41 : vector<8x8x4xf32> to vector<8x8x4xbf16>
    %c0_19 = arith.constant 0 : index
    %c0_20 = arith.constant 0 : index
    %c0_21 = arith.constant 0 : index
    %c0_22 = arith.constant 0 : index
    %43 = vector.load %arg8[%c0_19, %c0_20, %c0_21, %c0_22] : memref<1x8x8x4xbf16, #tpu.memory_space<vmem>>, vector<1x8x8x4xbf16>
    %44 = vector.shape_cast %43 : vector<1x8x8x4xbf16> to vector<8x8x4xbf16>
    %45 = vector.shape_cast %42 : vector<8x8x4xbf16> to vector<1x8x8x4xbf16>
    tpu.vector_store %arg8[%c0_19, %c0_20, %c0_21, %c0_22], %45 {strides = array<i32>} : memref<1x8x8x4xbf16, #tpu.memory_space<vmem>>, vector<1x8x8x4xbf16>,
    %46 = vector.extract_strided_slice %31 {offsets = [0, 64], sizes = [8, 32], strides = [1, 1]} : vector<8x96xf32> to vector<8x32xf32>
    %47 = vector.shape_cast %46 : vector<8x32xf32> to vector<8x8x4xf32>
    %48 = tpu.transpose %47, [1, 0, 2] : vector<8x8x4xf32> -> vector<8x8x4xf32>
    %49 = arith.truncf %48 : vector<8x8x4xf32> to vector<8x8x4xbf16>
    %c0_23 = arith.constant 0 : index
    %c0_24 = arith.constant 0 : index
    %c0_25 = arith.constant 0 : index
    %c0_26 = arith.constant 0 : index
    %50 = vector.load %arg9[%c0_23, %c0_24, %c0_25, %c0_26] : memref<1x8x8x4xbf16, #tpu.memory_space<vmem>>, vector<1x8x8x4xbf16>
    %51 = vector.shape_cast %50 : vector<1x8x8x4xbf16> to vector<8x8x4xbf16>
    %52 = vector.shape_cast %49 : vector<8x8x4xbf16> to vector<1x8x8x4xbf16>
    tpu.vector_store %arg9[%c0_23, %c0_24, %c0_25, %c0_26], %52 {strides = array<i32>} : memref<1x8x8x4xbf16, #tpu.memory_space<vmem>>, vector<1x8x8x4xbf16>,
    return
  }
  func.func @transform_0(%arg0: i32, %arg1: i32) -> (i32, i32, i32) {
    %c0_i32 = arith.constant 0 : i32
    %c0_i32_0 = arith.constant 0 : i32
    return %arg0, %arg1, %c0_i32 : i32, i32, i32
  }
  func.func @transform_1(%arg0: i32, %arg1: i32) -> (i32, i32) {
    %c0_i32 = arith.constant 0 : i32
    %c0_i32_0 = arith.constant 0 : i32
    %c0_i32_1 = arith.constant 0 : i32
    return %c0_i32, %c0_i32_0 : i32, i32
  }
  func.func @transform_2(%arg0: i32, %arg1: i32) -> (i32, i32) {
    %c0_i32 = arith.constant 0 : i32
    %c0_i32_0 = arith.constant 0 : i32
    %c0_i32_1 = arith.constant 0 : i32
    return %c0_i32, %c0_i32_0 : i32, i32
  }
  func.func @transform_3(%arg0: i32, %arg1: i32) -> (i32, i32) {
    %c0_i32 = arith.constant 0 : i32
    %c0_i32_0 = arith.constant 0 : i32
    %c0_i32_1 = arith.constant 0 : i32
    return %c0_i32, %c0_i32_0 : i32, i32
  }
  func.func @transform_4(%arg0: i32, %arg1: i32) -> (i32, i32) {
    %c0_i32 = arith.constant 0 : i32
    %c0_i32_0 = arith.constant 0 : i32
    %c0_i32_1 = arith.constant 0 : i32
    return %c0_i32, %c0_i32_0 : i32, i32
  }
  func.func @transform_5(%arg0: i32, %arg1: i32) -> (i32, i32, i32, i32) {
    %c0_i32 = arith.constant 0 : i32
    %c0_i32_0 = arith.constant 0 : i32
    %c0_i32_1 = arith.constant 0 : i32
    return %arg0, %c0_i32, %arg1, %c0_i32_0 : i32, i32, i32, i32
  }
  func.func @transform_6(%arg0: i32, %arg1: i32) -> (i32, i32, i32, i32) {
    %c0_i32 = arith.constant 0 : i32
    %c0_i32_0 = arith.constant 0 : i32
    %c0_i32_1 = arith.constant 0 : i32
    return %arg0, %c0_i32, %arg1, %c0_i32_0 : i32, i32, i32, i32
  }
  func.func @transform_7(%arg0: i32, %arg1: i32) -> (i32, i32, i32, i32) {
    %c0_i32 = arith.constant 0 : i32
    %c0_i32_0 = arith.constant 0 : i32
    %c0_i32_1 = arith.constant 0 : i32
    return %arg0, %c0_i32, %arg1, %c0_i32_0 : i32, i32, i32, i32
  }
}

</mosaic_0001>

<bundles_post_ra>
// kernel: tpu_custom_call.1
= control target key start
LH: loop header
LB: loop body
LE: loop exit
PB: predicated region body
PF: predicated region fallthrough
CT: control target
= control target key end

     0   :  { %13 = vsyncpa [#allocation3], 0  ;;  %s2258_s0 = inlined_call_operand.hbm [shape: f32[2,8,32], index: 0, kind: input, shape index: {}]   ;;  %s2259_s1 = inlined_call_operand.vmem [shape: f32[1,32], index: 1, kind: input, shape index: {}]   ;;  %s2260_s2 = inlined_call_operand.vmem [shape: f32[1,32], index: 2, kind: input, shape index: {}]   ;;  %s2261_s3 = inlined_call_operand.hbm [shape: bf16[32,96], index: 3, kind: input, shape index: {}]   ;;  %s2262_s4 = inlined_call_operand.vmem [shape: f32[1,96], index: 4, kind: input, shape index: {}]   ;;  %s2263_s5 = inlined_call_operand.vmem [shape: bf16[2,8,8,4], index: 5, kind: output, shape index: {0}]   ;;  %s2264_s6 = inlined_call_operand.vmem [shape: bf16[2,8,8,4], index: 6, kind: output, shape index: {1}]   ;;  %s2265_s7 = inlined_call_operand.vmem [shape: bf16[2,8,8,4], index: 7, kind: output, shape index: {2}]  }
   0x1   :  { %15 = vsyncpa [#allocation3 + $0x1], 0 }
   0x2   :  { %16 = vsyncpa [#allocation5], 0  ;;  %s1918_s24 = smov 0   ;;  %s1920_s25 = smov 0  }
   0x3   :  { %s1922_s26 = smov 0   ;;  %s1924_s27 = smov 0  }
   0x4   :  { %s1926_s28 = smov 0   ;;  %s1928_s29 = smov 0  }
   0x5 LB: > { %s1604_s30 = sadd.s32 4294967295, %s1859_s29   ;;  %p56_p0 = scmp.ne.s32.totalorder %s1843_s25, %s1839_s24  ;;  %s1859_s29 = sphi %s1928_s29, %s22_s29   ;;  %s1855_s28 = sphi %s1926_s28, %s2275_s28   ;;  %s1851_s27 = sphi %s1924_s27, %s2274_s27   ;;  %s1847_s26 = sphi %s1922_s26, %s2273_s26   ;;  %s1843_s25 = sphi %s1920_s25, %s2272_s25   ;;  %s1839_s24 = sphi %s1918_s24, %s2271_s24  }
   0x6   : > { %p1948_p1 = scmp.eq.s32.totalorder %s1604_s30, 0  ;;  %p1606_p2 = scmp.ge.s32.totalorder %s1859_s29, 1 }
   0x7   : > { %p235_p3 = scmp.lt.s32.totalorder %s1859_s29, 3  ;;  %s1861_s11 = smov [#allocation4]  }
   0x8   : > { %p1956_p4 = por %p1948_p1, %p56_p0  ;;  %s253_s12 = sshll.u32 %s1861_s11, 4  ;;  %s254_s12 = int_to_ptr.vmem [resolvable:$true] %s253_s12 }
   0x9   : > { %p1960_p5 = pnand %p1606_p2, %p235_p3  ;;  %s34_s14 = sadd.s32 1, %s1855_s28 }
   0xa   : > { %s1762_s15 = scalar_lea.vmem %s254_s12, 256  ;;  %p1770_p12 = scmp.lt.s32.totalorder %s254_s12, %s254_s12 }
   0xb   : > { %p1672_p6 = pneg %p1960_p5  ;;  %p1763_p9 = scmp.ne.s32.totalorder %s254_s12, %s1762_s15 }
   0xc   : > { %p1771_p13 = scmp.lt.s32.totalorder %s1762_s15, %s1762_s15 }
   0xd   : > { %p1968_p7 = pnand %p1672_p6, %p1948_p1 }
   0xe   : > { %p1772_p0 = por %p1771_p13, %p1770_p12 }
   0xf   : > { %p1753_p8 = pneg %p1968_p7 }
  0x11   : > { %p1765_p10 = pnand %p1763_p9, %p1753_p8 }
  0x13   : > { %p1766_p11 = pneg %p1765_p10 }
  0x15   : > { %p1773_p2 = pnand %p1772_p0, %p1766_p11 }
  0x17   : > { %1776 = shalt.err (!%p1773_p2)
}
  0x18   : > { %s1862_s16 = smov 64   ;;  %s1863_s17 = smov 4  }
  0x19   : > { %1675 = dma.hbm_to_vmem [thread:$0]  (!%p1968_p7), %s2261_s3, 256, %s254_s12, [#allocation5], %s1862_s16, %s1862_s16, %s1863_s17  }
  0x1a   : > { %p36_p3 = scmp.ge.s32.totalorder %s34_s14, 2  ;;  %s43_s20 = sadd.s32 1, %s1847_s26 }
  0x1b   : > { %p50_p6 = scmp.ne.s32.totalorder %s1847_s26, %s1843_s25  ;;  %p51_p8 = scmp.eq.s32.totalorder %s1859_s29, 0 }
  0x1c   : > { %s2277_s14 = smov (%p36_p3, %s34_s14), 0  ;;  %p1681_p10 = scmp.lt.s32.totalorder %s1859_s29, 2 }
  0x1d   : > { %p52_p9 = por %p51_p8, %p50_p6  ;;  %s38_s21 = ssub.s32 %s1855_s28, %s2277_s14 }
  0x1e   : > { %s270_s22 = sand.u32 1, %s1847_s26   ;;  %p41_p11 = scmp.eq.s32.totalorder %s38_s21, 0 }
  0x1f   : > { %s1609_s23 = sshll.u32 %s270_s22, 3  ;;  %s1610_s24 = sshll.u32 %s1855_s28, 7 }
  0x20   : > { %s1992_s30 = scalar_select %p41_p11, %s1847_s26, %s43_s20  }
  0x21   : > { %s280_s12 = scalar_lea.hbm %s2258_s0, %s1610_s24  ;;  %s274_s15 = scalar_lea.vmem [#allocation2], %s1609_s23 }
  0x22   : > { %s282_s16 = sshll.u32 %s274_s15, 4  ;;  %p1997_p7 = pnand %p1681_p10, %p52_p9  ;;  %s283_s16 = int_to_ptr.vmem [resolvable:$true] %s282_s16 }
  0x23   : > { %s271_s18 = scalar_lea.sflag [#allocation3], %s270_s22  ;;  %s1790_s19 = scalar_lea.vmem %s283_s16, 128 }
  0x24   : > { %p1779_p12 = pneg %p1997_p7  ;;  %p1791_p13 = scmp.ne.s32.totalorder %s283_s16, %s1790_s19 }
  0x25   : > { %s1864_s20 = smov [#allocation2]  }
  0x26   : > { %p1793_p0 = pnand %p1791_p13, %p1779_p12  ;;  %s1795_s21 = sshll.u32 %s1864_s20, 4  ;;  %s1796_s21 = int_to_ptr.vmem [resolvable:$false] %s1795_s21 }
  0x27   : > { %s1797_s11 = scalar_lea.vmem %s1796_s21, 256  ;;  %p1798_p3 = scmp.lt.s32.totalorder %s283_s16, %s1796_s21 }
  0x28   : > { %p1794_p2 = pneg %p1793_p0  ;;  %p1799_p6 = scmp.lt.s32.totalorder %s1797_s11, %s1790_s19 }
  0x2a   : > { %p1800_p8 = por %p1799_p6, %p1798_p3 }
  0x2c   : > { %p1801_p9 = pnand %p1800_p8, %p1794_p2 }
  0x2e   : > { %1804 = shalt.err (!%p1801_p9)
}
  0x2f   : > { %1679 = dma.hbm_to_vmem [thread:$0]  (!%p1997_p7), %s280_s12, 128, %s283_s16, %s271_s18  }
  0x30   : > { %291 = sbr.rel (%p1960_p5) target bundleno = 856 (0x358), region = 40  ;;  %s293_s22 = sand.u32 (!%p1960_p5), 1, %s1843_s25  }
  0x31   : > { %s1612_s23 = sshll.u32 (!%p1960_p5), %s293_s22, 3  ;;  %s294_s24 = scalar_lea.sflag (!%p1960_p5), [#allocation3], %s293_s22 }
  0x32   : > { %s297_s13 = scalar_lea.vmem (!%p1960_p5), [#allocation2], %s1612_s23 }
  0x35   : > { %1830 = dma.done.wait (%p1956_p4), %s294_s24, 128  }
  0x36   : > { %1832 = vsyncadd (%p1956_p4), %s294_s24, 4294967168 }
  0x37   : > { %1834 = dma.done.wait (%p1948_p1), [#allocation5], 256  }
  0x38   : > { %1836 = vsyncadd (%p1948_p1), [#allocation5], 4294967040  ;;  %vm379_vm0 = vcmask 261120   ;;  %v376_v0 = vld [vmem:[%s297_s13] sm:$0xff]  ;;  %v1747_v7 = vld [vmem:[#allocation4 + $0x8] sm:$0xff]   ;;  %v1865_v8 = vmov 0.0   ;;  %v502_v28 = vlaneseq }
  0x39   : > { %v380_v1 = vsel %vm379_vm0, %v376_v0, 0.0  ;;  %1658 = vmatprep.subr.bf16.mxu0 %v1865_v8  ;;  %vm1866_vm1 = vmmov 0   ;;  %v1748_v9 = vld [vmem:[#allocation4] sm:$0xff]   ;;  %v1620_v14 = vld [vmem:[%s2259_s1] ss:$0 sm:$0xff]  ;;  %s1867_s17 = smov 116  }
  0x3a   : > { %381 = vadd.xlane.f32.xlu0 %v380_v1  ;;  %1662 = vmatprep.mubr.msk.bf16.mxu0 %vm1866_vm1, %v1865_v8  ;;  %v1621_v16 = vld [vmem:[%s2260_s2] ss:$0 sm:$0xff]  ;;  %s1868_s18 = smov 124   ;;  %s1869_s19 = smov 64   ;;  %v1876_v26 = vmov 1983009808  }
  0x3b   : > { %1659 = vmatpush3.bf16.msra.mxu0 %v1747_v7  ;;  %v1622_v20 = vld [vmem:[%s2262_s4] ss:$0 sm:$0xff]  ;;  %s1870_s20 = smov 120   ;;  %s1871_s21 = smov 112   ;;  %v500_v27 = vunpack.c.l.s4 %v1876_v26  ;;  %v1877_v29 = vmov 1934713408  }
  0x3c   : > { %1660 = vmatprep.subr.bf16.mxu0 %v1865_v8  ;;  %s1872_s11 = smov 108   ;;  %s1873_s22 = smov 104   ;;  %v564_v30 = vunpack.c.l.s4 %v1877_v29  ;;  %v503_v32 = vshrl.u32 %v502_v28, 7  ;;  %vm777_vm2 = vcmask 27648  }
  0x3d   : > { %s1874_s23 = smov 100   ;;  %s1875_s24 = smov 96   ;;  %v501_v31 = vunpack.c.0.s8 %v500_v27 }
  0x3e   : > { %v565_v35 = vunpack.c.0.s8 %v564_v30  ;;  %p351_p1 = scmp.lt.s32.totalorder %s1851_s27, 1 }
  0x3f   : > { %1661 = vmatpush3.bf16.msra.mxu0 %v1748_v9  ;;  %v2036_v36 = vsub.s32 %v501_v31, %v503_v32 }
  0x40   : > { %v2045_v42 = vsub.s32 %v565_v35, %v503_v32  ;;  %s2279_s27 = smov (!%p351_p1, %s1851_s27), 1 }
  0x41   : > { %s2067_s13 = sshll.u32 %s2279_s27, 5 }
  0x42   : > { %s2078_s9 = scalar_lea.vmem %s2263_s5, %s2067_s13  ;;  %s2146_s15 = scalar_lea.vmem %s2264_s6, %s2067_s13 }
  0xc3   : > { %v382_v2 = vpop.xlane.xlu0 %381 }
  0xc4   : > { %v384_v3 = vmul.f32 0.03125, %v382_v2 }
  0xc6   : > { %v385_v4 = vsub.f32 %v376_v0, %v384_v3 }
  0xc8   : > { %v386_v5 = vmul.f32 %v385_v4, %v385_v4 }
  0xca   : > { %v387_v6 = vsel %vm379_vm0, %v386_v5, 0.0 }
  0xcb   : > { %388 = vadd.xlane.f32.xlu0 %v387_v6 }
 0x154   : > { %v389_v10 = vpop.xlane.xlu0 %388 }
 0x155   : > { %v390_v11 = vmul.f32 0.03125, %v389_v10 }
 0x157   : > { %v391_v12 = vadd.f32 1e-05, %v390_v11 }
 0x159   : > { %1749 = vrsqrt.f32 %v391_v12 }
 0x166   : > { %v1750_v13 = vpop.eup %1749 }
 0x167   : > { %v393_v15 = vmul.f32 %v1750_v13, %v385_v4 }
 0x169   : > { %v400_v17 = vmul.f32 %v1620_v14, %v393_v15 }
 0x16b   : > { %v407_v18 = vadd.f32 %v1621_v16, %v400_v17 }
 0x16d   : > { %v408_v19 = vpack.c.bf16 %v407_v18, %v407_v18 }
 0x16f   : > { %1663 = vmatmul.mubr.msk.bf16.vlgmr.msra.gmra.mxu0 %vm379_vm0, %v408_v19 }
 0x22f   : > { %v469_v21 = vpop.f32.mrf.mxu0 }
 0x230   : > { %v470_v22 = vadd.f32 %v1622_v20, %v469_v21 }
 0x231   : > { %v1664_v23 = vpop.f32.mrf.mxu0 }
 0x232   : > { %482 = vrot.lane.b32.xlu0 %v470_v22, %s1867_s17  ;;  %476 = vrot.lane.b32.xlu1 %v470_v22, %s1868_s18  ;;  %s2210_s18 = scalar_lea.vmem %s2265_s7, %s2067_s13 }
 0x233   : > { %v472_v24 = vpop.f32.mrf.mxu0 }
 0x235   : > { %v1665_v25 = vpop.f32.mrf.mxu0 }
 0x236   : > { %1098 = vrot.lane.b32.xlu0 %v470_v22, %s1869_s19  ;;  %479 = vrot.lane.b32.xlu1 %v470_v22, %s1870_s20 }
 0x23a   : > { %485 = vrot.lane.b32.xlu1 %v470_v22, %s1871_s21 }
 0x23e   : > { %488 = vrot.lane.b32.xlu1 %v470_v22, %s1872_s11 }
 0x242   : > { %491 = vrot.lane.b32.xlu1 %v470_v22, %s1873_s22 }
 0x246   : > { %494 = vrot.lane.b32.xlu1 %v470_v22, %s1874_s23 }
 0x24a   : > { %786 = vrot.lane.b32.xlu1 %v470_v22, %s1875_s24 }
 0x2a4   : > { %v2030_v33 = vpop.permute.xlu0 %482  ;;  %v2032_v34 = vpop.permute.xlu1 %476 }
 0x2a5   : > { %788 = vrot.lane.b32.xlu1 %v2032_v34, %s1875_s24  ;;  %v513_v37 = vcombine.low %v2032_v34, %v2030_v33  ;;  %v514_v38 = vcombine.high %v2032_v34, %v2030_v33 }
 0x2a7   : > { %v521_v43 = vrot.slane %v513_v37, %v2036_v36  ;;  %v528_v44 = vrot.slane %v514_v38, %v2036_v36 }
 0x2a8   : > { %v480_v39 = vpop.permute.xlu1 %479 }
 0x2a9   : > { %v497_v40 = vcombine.low %v470_v22, %v480_v39  ;;  %v498_v41 = vcombine.high %v470_v22, %v480_v39  ;;  %792 = vrot.lane.b32.xlu1 %v2030_v33, %s1875_s24  ;;  %790 = vrot.lane.b32.xlu0 %v480_v39, %s1875_s24 }
 0x2ab   : > { %v505_v45 = vrot.slane %v497_v40, %v2036_v36  ;;  %v512_v46 = vrot.slane %v498_v41, %v2036_v36 }
 0x2ac   : > { %v486_v47 = vpop.permute.xlu1 %485 }
 0x2ad   : > { %v561_v48 = vcombine.low %v505_v45, %v521_v43  ;;  %v562_v49 = vcombine.high %v505_v45, %v521_v43  ;;  %v577_v50 = vcombine.low %v512_v46, %v528_v44  ;;  %v578_v51 = vcombine.high %v512_v46, %v528_v44  ;;  %794 = vrot.lane.b32.xlu0 %v486_v47, %s1875_s24 }
 0x2af   : > { %v569_v52 = vrot.slane %v561_v48, %v2045_v42  ;;  %v576_v53 = vrot.slane %v562_v49, %v2045_v42  ;;  %v585_v54 = vrot.slane %v577_v50, %v2045_v42  ;;  %v592_v55 = vrot.slane %v578_v51, %v2045_v42 }
 0x2b0   : > { %v2057_v56 = vpop.permute.xlu1 %488 }
 0x2b1   : > { %v1626_v57 = vcombine.low %v569_v52, %v576_v53  ;;  %v1628_v58 = vcombine.high %v569_v52, %v576_v53  ;;  %v1630_v59 = vcombine.low %v585_v54, %v592_v55  ;;  %v1632_v60 = vcombine.high %v585_v54, %v592_v55  ;;  %796 = vrot.lane.b32.xlu1 %v2057_v56, %s1875_s24 }
 0x2b3   : > { %v641_v61 = vrot.slane %v1626_v57, %v2036_v36  ;;  %v657_v62 = vrot.slane %v1628_v58, %v2036_v36  ;;  %v673_v63 = vrot.slane %v1630_v59, %v2036_v36  ;;  %v689_v0 = vrot.slane %v1632_v60, %v2036_v36 }
 0x2b4   : > { %v492_v1 = vpop.permute.xlu1 %491 }
 0x2b5   : > { %v697_v2 = vcombine.low %v641_v61, %v657_v62  ;;  %v698_v3 = vcombine.high %v641_v61, %v657_v62  ;;  %v729_v4 = vcombine.low %v673_v63, %v689_v0  ;;  %v730_v5 = vcombine.high %v673_v63, %v689_v0  ;;  %798 = vrot.lane.b32.xlu0 %v492_v1, %s1875_s24  ;;  %v2124_v62 = vpop.permute.xlu0 %1098 }
 0x2b6   : > { %v529_v10 = vcombine.low %v486_v47, %v492_v1  ;;  %v530_v11 = vcombine.high %v486_v47, %v492_v1 }
 0x2b7   : > { %v705_v6 = vrot.slane %v697_v2, %v2045_v42  ;;  %v712_v7 = vrot.slane %v698_v3, %v2045_v42  ;;  %v737_v8 = vrot.slane %v729_v4, %v2045_v42  ;;  %v744_v9 = vrot.slane %v730_v5, %v2045_v42 }
 0x2b8   : > { %v495_v12 = vpop.permute.xlu1 %494  ;;  %v537_v23 = vrot.slane %v529_v10, %v2036_v36  ;;  %v544_v24 = vrot.slane %v530_v11, %v2036_v36 }
 0x2b9   : > { %v761_v13 = vcombine.low %v705_v6, %v737_v8  ;;  %v762_v14 = vcombine.high %v705_v6, %v737_v8  ;;  %v763_v15 = vcombine.low %v712_v7, %v744_v9  ;;  %v764_v16 = vcombine.high %v712_v7, %v744_v9  ;;  %1102 = vrot.lane.b32.xlu0 %v480_v39, %s1869_s19 }
 0x2ba   : > { %v545_v17 = vcombine.low %v2057_v56, %v495_v12  ;;  %v546_v18 = vcombine.high %v2057_v56, %v495_v12  ;;  %800 = vrot.lane.b32.xlu1 %v495_v12, %s1875_s24 }
 0x2bb   : > { %v769_v19 = vpack.c.bf16 %v761_v13, %v761_v13  ;;  %v770_v20 = vpack.c.bf16 %v762_v14, %v762_v14  ;;  %v771_v21 = vpack.c.bf16 %v763_v15, %v763_v15  ;;  %v772_v22 = vpack.c.bf16 %v764_v16, %v764_v16 }
 0x2bc   : > { %v553_v25 = vrot.slane %v545_v17, %v2036_v36  ;;  %v560_v26 = vrot.slane %v546_v18, %v2036_v36  ;;  %v787_v61 = vpop.permute.xlu1 %786 }
 0x2bd   : > { %778 = vst.msk [vmem:[%s2078_s9] sm:$0xf] %vm777_vm2, %v769_v19  ;;  %779 = vst.msk [vmem:[%s2078_s9 + $0x4] sm:$0xf] %vm777_vm2, %v770_v20  ;;  %1106 = vrot.lane.b32.xlu0 %v486_v47, %s1869_s19 }
 0x2be   : > { %780 = vst.msk [vmem:[%s2078_s9 + $0x8] sm:$0xf] %vm777_vm2, %v771_v21  ;;  %781 = vst.msk [vmem:[%s2078_s9 + $0xc] sm:$0xf] %vm777_vm2, %v772_v22  ;;  %v593_v27 = vcombine.low %v537_v23, %v553_v25  ;;  %v594_v28 = vcombine.high %v537_v23, %v553_v25  ;;  %v609_v29 = vcombine.low %v544_v24, %v560_v26  ;;  %1100 = vrot.lane.b32.xlu1 %v2032_v34, %s1869_s19 }
 0x2bf   : > { %v610_v30 = vcombine.high %v544_v24, %v560_v26 }
 0x2c0   : > { %v601_v31 = vrot.slane %v593_v27, %v2045_v42  ;;  %v608_v32 = vrot.slane %v594_v28, %v2045_v42  ;;  %v617_v35 = vrot.slane %v609_v29, %v2045_v42 }
 0x2c1   : > { %v624_v37 = vrot.slane %v610_v30, %v2045_v42  ;;  %1110 = vrot.lane.b32.xlu0 %v492_v1, %s1869_s19 }
 0x2c2   : > { %v1627_v38 = vcombine.low %v601_v31, %v608_v32  ;;  %v1629_v39 = vcombine.high %v601_v31, %v608_v32  ;;  %1104 = vrot.lane.b32.xlu1 %v2030_v33, %s1869_s19 }
 0x2c3   : > { %v1631_v40 = vcombine.low %v617_v35, %v624_v37  ;;  %v1633_v41 = vcombine.high %v617_v35, %v624_v37 }
 0x2c4   : > { %v648_v43 = vrot.slane %v1627_v38, %v2036_v36  ;;  %v664_v34 = vrot.slane %v1629_v39, %v2036_v36 }
 0x2c5   : > { %v680_v44 = vrot.slane %v1631_v40, %v2036_v36  ;;  %v696_v45 = vrot.slane %v1633_v41, %v2036_v36 }
 0x2c6   : > { %v713_v46 = vcombine.low %v648_v43, %v664_v34  ;;  %v714_v47 = vcombine.high %v648_v43, %v664_v34  ;;  %1108 = vrot.lane.b32.xlu1 %v2057_v56, %s1869_s19 }
 0x2c7   : > { %v745_v48 = vcombine.low %v680_v44, %v696_v45  ;;  %v746_v49 = vcombine.high %v680_v44, %v696_v45 }
 0x2c8   : > { %v721_v33 = vrot.slane %v713_v46, %v2045_v42  ;;  %v728_v50 = vrot.slane %v714_v47, %v2045_v42 }
 0x2c9   : > { %v753_v51 = vrot.slane %v745_v48, %v2045_v42  ;;  %v760_v52 = vrot.slane %v746_v49, %v2045_v42 }
 0x2ca   : > { %1112 = vrot.lane.b32.xlu1 %v495_v12, %s1869_s19 }
 0x2cb   : > { %v765_v53 = vcombine.low %v721_v33, %v753_v51  ;;  %v766_v54 = vcombine.high %v721_v33, %v753_v51  ;;  %v767_v55 = vcombine.low %v728_v50, %v760_v52  ;;  %v768_v57 = vcombine.high %v728_v50, %v760_v52 }
 0x2cd   : > { %v773_v58 = vpack.c.bf16 %v765_v53, %v765_v53  ;;  %v774_v59 = vpack.c.bf16 %v766_v54, %v766_v54  ;;  %v775_v60 = vpack.c.bf16 %v767_v55, %v767_v55  ;;  %v776_v56 = vpack.c.bf16 %v768_v57, %v768_v57 }
 0x2cf   : > { %782 = vst.msk [vmem:[%s2078_s9 + $0x10] sm:$0xf] %vm777_vm2, %v773_v58  ;;  %783 = vst.msk [vmem:[%s2078_s9 + $0x14] sm:$0xf] %vm777_vm2, %v774_v59 }
 0x2d0   : > { %784 = vst.msk [vmem:[%s2078_s9 + $0x18] sm:$0xf] %vm777_vm2, %v775_v60  ;;  %785 = vst.msk [vmem:[%s2078_s9 + $0x1c] sm:$0xf] %vm777_vm2, %v776_v56 }
 0x317   : > { %v789_v63 = vpop.permute.xlu1 %788 }
 0x31b   : > { %v791_v0 = vpop.permute.xlu0 %790  ;;  %v793_v1 = vpop.permute.xlu1 %792 }
 0x31c   : > { %v810_v2 = vcombine.low %v787_v61, %v791_v0  ;;  %v811_v3 = vcombine.high %v787_v61, %v791_v0  ;;  %v826_v4 = vcombine.low %v789_v63, %v793_v1  ;;  %v827_v5 = vcombine.high %v789_v63, %v793_v1 }
 0x31e   : > { %v818_v6 = vrot.slane %v810_v2, %v2036_v36  ;;  %v825_v7 = vrot.slane %v811_v3, %v2036_v36  ;;  %v834_v8 = vrot.slane %v826_v4, %v2036_v36  ;;  %v841_v9 = vrot.slane %v827_v5, %v2036_v36 }
 0x31f   : > { %v795_v18 = vpop.permute.xlu0 %794 }
 0x320   : > { %v874_v10 = vcombine.low %v818_v6, %v834_v8  ;;  %v875_v11 = vcombine.high %v818_v6, %v834_v8  ;;  %v890_v12 = vcombine.low %v825_v7, %v841_v9  ;;  %v891_v13 = vcombine.high %v825_v7, %v841_v9 }
 0x322   : > { %v882_v14 = vrot.slane %v874_v10, %v2045_v42  ;;  %v889_v15 = vrot.slane %v875_v11, %v2045_v42  ;;  %v898_v16 = vrot.slane %v890_v12, %v2045_v42  ;;  %v905_v17 = vrot.slane %v891_v13, %v2045_v42 }
 0x323   : > { %v797_v32 = vpop.permute.xlu1 %796 }
 0x324   : > { %v1634_v19 = vcombine.low %v882_v14, %v889_v15  ;;  %v1636_v20 = vcombine.high %v882_v14, %v889_v15  ;;  %v1638_v21 = vcombine.low %v898_v16, %v905_v17  ;;  %v1640_v22 = vcombine.high %v898_v16, %v905_v17 }
 0x326   : > { %v954_v23 = vrot.slane %v1634_v19, %v2036_v36  ;;  %v970_v24 = vrot.slane %v1636_v20, %v2036_v36  ;;  %v986_v25 = vrot.slane %v1638_v21, %v2036_v36  ;;  %v1002_v26 = vrot.slane %v1640_v22, %v2036_v36 }
 0x327   : > { %v799_v27 = vpop.permute.xlu0 %798 }
 0x328   : > { %v1010_v28 = vcombine.low %v954_v23, %v970_v24  ;;  %v1011_v29 = vcombine.high %v954_v23, %v970_v24  ;;  %v1042_v30 = vcombine.low %v986_v25, %v1002_v26  ;;  %v1043_v31 = vcombine.high %v986_v25, %v1002_v26 }
 0x329   : > { %v842_v40 = vcombine.low %v795_v18, %v799_v27  ;;  %v843_v41 = vcombine.high %v795_v18, %v799_v27 }
 0x32a   : > { %v1018_v35 = vrot.slane %v1010_v28, %v2045_v42  ;;  %v1025_v37 = vrot.slane %v1011_v29, %v2045_v42  ;;  %v1050_v38 = vrot.slane %v1042_v30, %v2045_v42  ;;  %v1057_v39 = vrot.slane %v1043_v31, %v2045_v42 }
 0x32b   : > { %v1103_v43 = vpop.permute.xlu0 %1102  ;;  %v850_v53 = vrot.slane %v842_v40, %v2036_v36  ;;  %v857_v54 = vrot.slane %v843_v41, %v2036_v36 }
 0x32c   : > { %v1074_v34 = vcombine.low %v1018_v35, %v1050_v38  ;;  %v1075_v44 = vcombine.high %v1018_v35, %v1050_v38  ;;  %v1076_v45 = vcombine.low %v1025_v37, %v1057_v39  ;;  %v1077_v46 = vcombine.high %v1025_v37, %v1057_v39  ;;  %v801_v47 = vpop.permute.xlu1 %800 }
 0x32d   : > { %v858_v48 = vcombine.low %v797_v32, %v801_v47  ;;  %v859_v49 = vcombine.high %v797_v32, %v801_v47  ;;  %v1122_v0 = vcombine.low %v2124_v62, %v1103_v43  ;;  %v1123_v1 = vcombine.high %v2124_v62, %v1103_v43 }
 0x32e   : > { %v1082_v33 = vpack.c.bf16 %v1074_v34, %v1074_v34  ;;  %v1083_v50 = vpack.c.bf16 %v1075_v44, %v1075_v44  ;;  %v1084_v51 = vpack.c.bf16 %v1076_v45, %v1076_v45  ;;  %v1085_v52 = vpack.c.bf16 %v1077_v46, %v1077_v46 }
 0x32f   : > { %v866_v55 = vrot.slane %v858_v48, %v2036_v36  ;;  %v873_v57 = vrot.slane %v859_v49, %v2036_v36  ;;  %v2152_v58 = vpop.permute.xlu0 %1106  ;;  %v1130_v12 = vrot.slane %v1122_v0, %v2036_v36  ;;  %v1137_v13 = vrot.slane %v1123_v1, %v2036_v36 }
 0x330   : > { %1090 = vst.msk [vmem:[%s2146_s15] sm:$0xf] %vm777_vm2, %v1082_v33  ;;  %1091 = vst.msk [vmem:[%s2146_s15 + $0x4] sm:$0xf] %vm777_vm2, %v1083_v50  ;;  %v1101_v59 = vpop.permute.xlu1 %1100 }
 0x331   : > { %1092 = vst.msk [vmem:[%s2146_s15 + $0x8] sm:$0xf] %vm777_vm2, %v1084_v51  ;;  %1093 = vst.msk [vmem:[%s2146_s15 + $0xc] sm:$0xf] %vm777_vm2, %v1085_v52  ;;  %v906_v60 = vcombine.low %v850_v53, %v866_v55  ;;  %v907_v56 = vcombine.high %v850_v53, %v866_v55  ;;  %v922_v61 = vcombine.low %v857_v54, %v873_v57 }
 0x332   : > { %v923_v63 = vcombine.high %v857_v54, %v873_v57 }
 0x333   : > { %v914_v2 = vrot.slane %v906_v60, %v2045_v42  ;;  %v921_v3 = vrot.slane %v907_v56, %v2045_v42  ;;  %v930_v4 = vrot.slane %v922_v61, %v2045_v42  ;;  %v1111_v11 = vpop.permute.xlu0 %1110 }
 0x334   : > { %v937_v5 = vrot.slane %v923_v63, %v2045_v42  ;;  %v1105_v6 = vpop.permute.xlu1 %1104  ;;  %v1154_v19 = vcombine.low %v2152_v58, %v1111_v11  ;;  %v1155_v20 = vcombine.high %v2152_v58, %v1111_v11 }
 0x335   : > { %v1635_v7 = vcombine.low %v914_v2, %v921_v3  ;;  %v1637_v8 = vcombine.high %v914_v2, %v921_v3  ;;  %v1138_v14 = vcombine.low %v1101_v59, %v1105_v6  ;;  %v1139_v62 = vcombine.high %v1101_v59, %v1105_v6 }
 0x336   : > { %v1639_v9 = vcombine.low %v930_v4, %v937_v5  ;;  %v1641_v10 = vcombine.high %v930_v4, %v937_v5  ;;  %v1162_v2 = vrot.slane %v1154_v19, %v2036_v36  ;;  %v1169_v3 = vrot.slane %v1155_v20, %v2036_v36 }
 0x337   : > { %v961_v15 = vrot.slane %v1635_v7, %v2036_v36  ;;  %v977_v16 = vrot.slane %v1637_v8, %v2036_v36  ;;  %v1146_v21 = vrot.slane %v1138_v14, %v2036_v36  ;;  %v1153_v22 = vrot.slane %v1139_v62, %v2036_v36 }
 0x338   : > { %v993_v17 = vrot.slane %v1639_v9, %v2036_v36  ;;  %v1009_v18 = vrot.slane %v1641_v10, %v2036_v36  ;;  %v1109_v23 = vpop.permute.xlu1 %1108 }
 0x339   : > { %v1026_v24 = vcombine.low %v961_v15, %v977_v16  ;;  %v1027_v25 = vcombine.high %v961_v15, %v977_v16  ;;  %v1186_v28 = vcombine.low %v1130_v12, %v1146_v21  ;;  %v1187_v29 = vcombine.high %v1130_v12, %v1146_v21 }
 0x33a   : > { %v1058_v26 = vcombine.low %v993_v17, %v1009_v18  ;;  %v1059_v27 = vcombine.high %v993_v17, %v1009_v18  ;;  %v1202_v30 = vcombine.low %v1137_v13, %v1153_v22  ;;  %v1203_v31 = vcombine.high %v1137_v13, %v1153_v22 }
 0x33b   : > { %v1034_v32 = vrot.slane %v1026_v24, %v2045_v42  ;;  %v1041_v35 = vrot.slane %v1027_v25, %v2045_v42  ;;  %v1194_v39 = vrot.slane %v1186_v28, %v2045_v42  ;;  %v1201_v40 = vrot.slane %v1187_v29, %v2045_v42 }
 0x33c   : > { %v1066_v37 = vrot.slane %v1058_v26, %v2045_v42  ;;  %v1073_v38 = vrot.slane %v1059_v27, %v2045_v42  ;;  %v1210_v41 = vrot.slane %v1202_v30, %v2045_v42  ;;  %v1217_v43 = vrot.slane %v1203_v31, %v2045_v42  ;;  %v1113_v50 = vpop.permute.xlu1 %1112 }
 0x33d   : > { %v1642_v47 = vcombine.low %v1194_v39, %v1201_v40  ;;  %v1644_v48 = vcombine.high %v1194_v39, %v1201_v40  ;;  %v1170_v60 = vcombine.low %v1109_v23, %v1113_v50  ;;  %v1171_v56 = vcombine.high %v1109_v23, %v1113_v50 }
 0x33e   : > { %v1078_v34 = vcombine.low %v1034_v32, %v1066_v37  ;;  %v1079_v44 = vcombine.high %v1034_v32, %v1066_v37  ;;  %v1080_v45 = vcombine.low %v1041_v35, %v1073_v38  ;;  %v1081_v46 = vcombine.high %v1041_v35, %v1073_v38 }
 0x33f   : > { %v1646_v49 = vcombine.low %v1210_v41, %v1217_v43  ;;  %v1648_v33 = vcombine.high %v1210_v41, %v1217_v43  ;;  %v1266_v55 = vrot.slane %v1642_v47, %v2036_v36  ;;  %v1282_v57 = vrot.slane %v1644_v48, %v2036_v36 }
 0x340   : > { %v1086_v51 = vpack.c.bf16 %v1078_v34, %v1078_v34  ;;  %v1087_v52 = vpack.c.bf16 %v1079_v44, %v1079_v44  ;;  %v1088_v53 = vpack.c.bf16 %v1080_v45, %v1080_v45  ;;  %v1089_v54 = vpack.c.bf16 %v1081_v46, %v1081_v46 }
 0x341   : > { %v1298_v58 = vrot.slane %v1646_v49, %v2036_v36  ;;  %v1314_v59 = vrot.slane %v1648_v33, %v2036_v36  ;;  %v1322_v61 = vcombine.low %v1266_v55, %v1282_v57  ;;  %v1323_v63 = vcombine.high %v1266_v55, %v1282_v57 }
 0x342   : > { %1094 = vst.msk [vmem:[%s2146_s15 + $0x10] sm:$0xf] %vm777_vm2, %v1086_v51  ;;  %1095 = vst.msk [vmem:[%s2146_s15 + $0x14] sm:$0xf] %vm777_vm2, %v1087_v52  ;;  %v1178_v4 = vrot.slane %v1170_v60, %v2036_v36  ;;  %v1185_v5 = vrot.slane %v1171_v56, %v2036_v36 }
 0x343   : > { %1096 = vst.msk [vmem:[%s2146_s15 + $0x18] sm:$0xf] %vm777_vm2, %v1088_v53  ;;  %1097 = vst.msk [vmem:[%s2146_s15 + $0x1c] sm:$0xf] %vm777_vm2, %v1089_v54  ;;  %v1354_v0 = vcombine.low %v1298_v58, %v1314_v59  ;;  %v1355_v1 = vcombine.high %v1298_v58, %v1314_v59  ;;  %v1330_v6 = vrot.slane %v1322_v61, %v2045_v42 }
 0x344   : > { %v1337_v7 = vrot.slane %v1323_v63, %v2045_v42  ;;  %v1218_v10 = vcombine.low %v1162_v2, %v1178_v4  ;;  %v1219_v11 = vcombine.high %v1162_v2, %v1178_v4  ;;  %v1234_v12 = vcombine.low %v1169_v3, %v1185_v5 }
 0x345   : > { %v1362_v8 = vrot.slane %v1354_v0, %v2045_v42  ;;  %v1369_v9 = vrot.slane %v1355_v1, %v2045_v42  ;;  %v1235_v13 = vcombine.high %v1169_v3, %v1185_v5 }
 0x346   : > { %v1226_v17 = vrot.slane %v1218_v10, %v2045_v42  ;;  %v1233_v18 = vrot.slane %v1219_v11, %v2045_v42  ;;  %v1242_v19 = vrot.slane %v1234_v12, %v2045_v42 }
 0x347   : > { %v1386_v14 = vcombine.low %v1330_v6, %v1362_v8  ;;  %v1387_v62 = vcombine.high %v1330_v6, %v1362_v8  ;;  %v1388_v15 = vcombine.low %v1337_v7, %v1369_v9  ;;  %v1389_v16 = vcombine.high %v1337_v7, %v1369_v9 }
 0x348   : > { %v1249_v20 = vrot.slane %v1235_v13, %v2045_v42  ;;  %v1643_v25 = vcombine.low %v1226_v17, %v1233_v18  ;;  %v1645_v26 = vcombine.high %v1226_v17, %v1233_v18 }
 0x349   : > { %v1394_v21 = vpack.c.bf16 %v1386_v14, %v1386_v14  ;;  %v1395_v22 = vpack.c.bf16 %v1387_v62, %v1387_v62  ;;  %v1396_v23 = vpack.c.bf16 %v1388_v15, %v1388_v15  ;;  %v1397_v24 = vpack.c.bf16 %v1389_v16, %v1389_v16 }
 0x34a   : > { %v1647_v27 = vcombine.low %v1242_v19, %v1249_v20  ;;  %v1649_v28 = vcombine.high %v1242_v19, %v1249_v20  ;;  %v1273_v29 = vrot.slane %v1643_v25, %v2036_v36  ;;  %v1289_v30 = vrot.slane %v1645_v26, %v2036_v36 }
 0x34b   : > { %1402 = vst.msk [vmem:[%s2210_s18] sm:$0xf] %vm777_vm2, %v1394_v21  ;;  %1403 = vst.msk [vmem:[%s2210_s18 + $0x4] sm:$0xf] %vm777_vm2, %v1395_v22 }
 0x34c   : > { %1404 = vst.msk [vmem:[%s2210_s18 + $0x8] sm:$0xf] %vm777_vm2, %v1396_v23  ;;  %1405 = vst.msk [vmem:[%s2210_s18 + $0xc] sm:$0xf] %vm777_vm2, %v1397_v24  ;;  %v1305_v31 = vrot.slane %v1647_v27, %v2036_v36  ;;  %v1321_v32 = vrot.slane %v1649_v28, %v2036_v36  ;;  %v1338_v35 = vcombine.low %v1273_v29, %v1289_v30 }
 0x34d   : > { %v1339_v37 = vcombine.high %v1273_v29, %v1289_v30 }
 0x34e   : > { %v1370_v38 = vcombine.low %v1305_v31, %v1321_v32  ;;  %v1371_v39 = vcombine.high %v1305_v31, %v1321_v32  ;;  %v1346_v40 = vrot.slane %v1338_v35, %v2045_v42 }
 0x34f   : > { %v1353_v41 = vrot.slane %v1339_v37, %v2045_v42 }
 0x350   : > { %v1378_v43 = vrot.slane %v1370_v38, %v2045_v42  ;;  %v1385_v34 = vrot.slane %v1371_v39, %v2045_v42 }
 0x352   : > { %v1390_v44 = vcombine.low %v1346_v40, %v1378_v43  ;;  %v1391_v45 = vcombine.high %v1346_v40, %v1378_v43  ;;  %v1392_v46 = vcombine.low %v1353_v41, %v1385_v34  ;;  %v1393_v36 = vcombine.high %v1353_v41, %v1385_v34 }
 0x354   : > { %v1398_v47 = vpack.c.bf16 %v1390_v44, %v1390_v44  ;;  %v1399_v48 = vpack.c.bf16 %v1391_v45, %v1391_v45  ;;  %v1400_v49 = vpack.c.bf16 %v1392_v46, %v1392_v46  ;;  %v1401_v33 = vpack.c.bf16 %v1393_v36, %v1393_v36 }
 0x356   : > { %1406 = vst.msk [vmem:[%s2210_s18 + $0x10] sm:$0xf] %vm777_vm2, %v1398_v47  ;;  %1407 = vst.msk [vmem:[%s2210_s18 + $0x14] sm:$0xf] %vm777_vm2, %v1399_v48 }
 0x357   : > { %1408 = vst.msk [vmem:[%s2210_s18 + $0x18] sm:$0xf] %vm777_vm2, %v1400_v49  ;;  %1409 = vst.msk [vmem:[%s2210_s18 + $0x1c] sm:$0xf] %vm777_vm2, %v1401_v33 }
 0x358 PF: > { %s22_s29 = sadd.s32 1, %s1859_s29   ;;  %s2271_s24 = smov %s1843_s25 }
 0x359   : > { %p19_p4 = scmp.ge.s32.totalorder %s22_s29, 4   ;;  %s2272_s25 = smov %s1847_s26 }
 0x35a   : > { %s2273_s26 = smov %s1992_s30  ;;  %s2274_s27 = smov %s1855_s28 }
 0x35b   : > { %s2275_s28 = smov %s2277_s14  ;;  %21 = sbr.rel (!%p19_p4) target bundleno = 5 (0x5), region = 108 }
 0x360   :  { %1481 = vsyncpa [#allocation3], 1 }
 0x361   :  { %1483 = vsyncpa [#allocation3 + $0x1], 1 }
 0x362   :  { %1484 = vsyncpa [#allocation5], 1 }

// kernel: tpu_custom_call.1
= control target key start
LH: loop header
LB: loop body
LE: loop exit
PB: predicated region body
PF: predicated region fallthrough
CT: control target
= control target key end

     0   :  { %13 = vsyncpa [#allocation3], 0  ;;  %s2258_s0 = inlined_call_operand.hbm [shape: f32[2,8,32], index: 0, kind: input, shape index: {}]   ;;  %s2259_s1 = inlined_call_operand.vmem [shape: f32[1,32], index: 1, kind: input, shape index: {}]   ;;  %s2260_s2 = inlined_call_operand.vmem [shape: f32[1,32], index: 2, kind: input, shape index: {}]   ;;  %s2261_s3 = inlined_call_operand.hbm [shape: bf16[32,96], index: 3, kind: input, shape index: {}]   ;;  %s2262_s4 = inlined_call_operand.vmem [shape: f32[1,96], index: 4, kind: input, shape index: {}]   ;;  %s2263_s5 = inlined_call_operand.vmem [shape: bf16[2,8,8,4], index: 5, kind: output, shape index: {0}]   ;;  %s2264_s6 = inlined_call_operand.vmem [shape: bf16[2,8,8,4], index: 6, kind: output, shape index: {1}]   ;;  %s2265_s7 = inlined_call_operand.vmem [shape: bf16[2,8,8,4], index: 7, kind: output, shape index: {2}]  }
   0x1   :  { %15 = vsyncpa [#allocation3 + $0x1], 0 }
   0x2   :  { %16 = vsyncpa [#allocation5], 0  ;;  %s1918_s24 = smov 0   ;;  %s1920_s25 = smov 0  }
   0x3   :  { %s1922_s26 = smov 0   ;;  %s1924_s27 = smov 0  }
   0x4   :  { %s1926_s28 = smov 0   ;;  %s1928_s29 = smov 0  }
   0x5 LB: > { %s1604_s30 = sadd.s32 4294967295, %s1859_s29   ;;  %p56_p0 = scmp.ne.s32.totalorder %s1843_s25, %s1839_s24  ;;  %s1859_s29 = sphi %s1928_s29, %s22_s29   ;;  %s1855_s28 = sphi %s1926_s28, %s2275_s28   ;;  %s1851_s27 = sphi %s1924_s27, %s2274_s27   ;;  %s1847_s26 = sphi %s1922_s26, %s2273_s26   ;;  %s1843_s25 = sphi %s1920_s25, %s2272_s25   ;;  %s1839_s24 = sphi %s1918_s24, %s2271_s24  }
   0x6   : > { %p1948_p1 = scmp.eq.s32.totalorder %s1604_s30, 0  ;;  %p1606_p2 = scmp.ge.s32.totalorder %s1859_s29, 1 }
   0x7   : > { %p235_p3 = scmp.lt.s32.totalorder %s1859_s29, 3  ;;  %s1861_s11 = smov [#allocation4]  }
   0x8   : > { %p1956_p4 = por %p1948_p1, %p56_p0  ;;  %s253_s12 = sshll.u32 %s1861_s11, 4  ;;  %s254_s12 = int_to_ptr.vmem [resolvable:$true] %s253_s12 }
   0x9   : > { %p1960_p5 = pnand %p1606_p2, %p235_p3  ;;  %s34_s14 = sadd.s32 1, %s1855_s28 }
   0xa   : > { %s1762_s15 = scalar_lea.vmem %s254_s12, 256  ;;  %p1770_p12 = scmp.lt.s32.totalorder %s254_s12, %s254_s12 }
   0xb   : > { %p1672_p6 = pneg %p1960_p5  ;;  %p1763_p9 = scmp.ne.s32.totalorder %s254_s12, %s1762_s15 }
   0xc   : > { %p1771_p13 = scmp.lt.s32.totalorder %s1762_s15, %s1762_s15 }
   0xd   : > { %p1968_p7 = pnand %p1672_p6, %p1948_p1 }
   0xe   : > { %p1772_p0 = por %p1771_p13, %p1770_p12 }
   0xf   : > { %p1753_p8 = pneg %p1968_p7 }
  0x11   : > { %p1765_p10 = pnand %p1763_p9, %p1753_p8 }
  0x13   : > { %p1766_p11 = pneg %p1765_p10 }
  0x15   : > { %p1773_p2 = pnand %p1772_p0, %p1766_p11 }
  0x17   : > { %1776 = shalt.err (!%p1773_p2)
}
  0x18   : > { %s1862_s16 = smov 64   ;;  %s1863_s17 = smov 4  }
  0x19   : > { %1675 = dma.hbm_to_vmem [thread:$0]  (!%p1968_p7), %s2261_s3, 256, %s254_s12, [#allocation5], %s1862_s16, %s1862_s16, %s1863_s17  }
  0x1a   : > { %p36_p3 = scmp.ge.s32.totalorder %s34_s14, 2  ;;  %s43_s20 = sadd.s32 1, %s1847_s26 }
  0x1b   : > { %p50_p6 = scmp.ne.s32.totalorder %s1847_s26, %s1843_s25  ;;  %p51_p8 = scmp.eq.s32.totalorder %s1859_s29, 0 }
  0x1c   : > { %s2277_s14 = smov (%p36_p3, %s34_s14), 0  ;;  %p1681_p10 = scmp.lt.s32.totalorder %s1859_s29, 2 }
  0x1d   : > { %p52_p9 = por %p51_p8, %p50_p6  ;;  %s38_s21 = ssub.s32 %s1855_s28, %s2277_s14 }
  0x1e   : > { %s270_s22 = sand.u32 1, %s1847_s26   ;;  %p41_p11 = scmp.eq.s32.totalorder %s38_s21, 0 }
  0x1f   : > { %s1609_s23 = sshll.u32 %s270_s22, 3  ;;  %s1610_s24 = sshll.u32 %s1855_s28, 7 }
  0x20   : > { %s1992_s30 = scalar_select %p41_p11, %s1847_s26, %s43_s20  }
  0x21   : > { %s280_s12 = scalar_lea.hbm %s2258_s0, %s1610_s24  ;;  %s274_s15 = scalar_lea.vmem [#allocation2], %s1609_s23 }
  0x22   : > { %s282_s16 = sshll.u32 %s274_s15, 4  ;;  %p1997_p7 = pnand %p1681_p10, %p52_p9  ;;  %s283_s16 = int_to_ptr.vmem [resolvable:$true] %s282_s16 }
  0x23   : > { %s271_s18 = scalar_lea.sflag [#allocation3], %s270_s22  ;;  %s1790_s19 = scalar_lea.vmem %s283_s16, 128 }
  0x24   : > { %p1779_p12 = pneg %p1997_p7  ;;  %p1791_p13 = scmp.ne.s32.totalorder %s283_s16, %s1790_s19 }
  0x25   : > { %s1864_s20 = smov [#allocation2]  }
  0x26   : > { %p1793_p0 = pnand %p1791_p13, %p1779_p12  ;;  %s1795_s21 = sshll.u32 %s1864_s20, 4  ;;  %s1796_s21 = int_to_ptr.vmem [resolvable:$false] %s1795_s21 }
  0x27   : > { %s1797_s11 = scalar_lea.vmem %s1796_s21, 256  ;;  %p1798_p3 = scmp.lt.s32.totalorder %s283_s16, %s1796_s21 }
  0x28   : > { %p1794_p2 = pneg %p1793_p0  ;;  %p1799_p6 = scmp.lt.s32.totalorder %s1797_s11, %s1790_s19 }
  0x2a   : > { %p1800_p8 = por %p1799_p6, %p1798_p3 }
  0x2c   : > { %p1801_p9 = pnand %p1800_p8, %p1794_p2 }
  0x2e   : > { %1804 = shalt.err (!%p1801_p9)
}
  0x2f   : > { %1679 = dma.hbm_to_vmem [thread:$0]  (!%p1997_p7), %s280_s12, 128, %s283_s16, %s271_s18  }
  0x30   : > { %291 = sbr.rel (%p1960_p5) target bundleno = 856 (0x358), region = 40  ;;  %s293_s22 = sand.u32 (!%p1960_p5), 1, %s1843_s25  }
  0x31   : > { %s1612_s23 = sshll.u32 (!%p1960_p5), %s293_s22, 3  ;;  %s294_s24 = scalar_lea.sflag (!%p1960_p5), [#allocation3], %s293_s22 }
  0x32   : > { %s297_s13 = scalar_lea.vmem (!%p1960_p5), [#allocation2], %s1612_s23 }
  0x35   : > { %1830 = dma.done.wait (%p1956_p4), %s294_s24, 128  }
  0x36   : > { %1832 = vsyncadd (%p1956_p4), %s294_s24, 4294967168 }
  0x37   : > { %1834 = dma.done.wait (%p1948_p1), [#allocation5], 256  }
  0x38   : > { %1836 = vsyncadd (%p1948_p1), [#allocation5], 4294967040  ;;  %vm379_vm0 = vcmask 261120   ;;  %v376_v0 = vld [vmem:[%s297_s13] sm:$0xff]  ;;  %v1747_v7 = vld [vmem:[#allocation4 + $0x8] sm:$0xff]   ;;  %v1865_v8 = vmov 0.0   ;;  %v502_v28 = vlaneseq }
  0x39   : > { %v380_v1 = vsel %vm379_vm0, %v376_v0, 0.0  ;;  %1658 = vmatprep.subr.bf16.mxu0 %v1865_v8  ;;  %vm1866_vm1 = vmmov 0   ;;  %v1748_v9 = vld [vmem:[#allocation4] sm:$0xff]   ;;  %v1620_v14 = vld [vmem:[%s2259_s1] ss:$0 sm:$0xff]  ;;  %s1867_s17 = smov 116  }
  0x3a   : > { %381 = vadd.xlane.f32.xlu0 %v380_v1  ;;  %1662 = vmatprep.mubr.msk.bf16.mxu0 %vm1866_vm1, %v1865_v8  ;;  %v1621_v16 = vld [vmem:[%s2260_s2] ss:$0 sm:$0xff]  ;;  %s1868_s18 = smov 124   ;;  %s1869_s19 = smov 64   ;;  %v1876_v26 = vmov 1983009808  }
  0x3b   : > { %1659 = vmatpush3.bf16.msra.mxu0 %v1747_v7  ;;  %v1622_v20 = vld [vmem:[%s2262_s4] ss:$0 sm:$0xff]  ;;  %s1870_s20 = smov 120   ;;  %s1871_s21 = smov 112   ;;  %v500_v27 = vunpack.c.l.s4 %v1876_v26  ;;  %v1877_v29 = vmov 1934713408  }
  0x3c   : > { %1660 = vmatprep.subr.bf16.mxu0 %v1865_v8  ;;  %s1872_s11 = smov 108   ;;  %s1873_s22 = smov 104   ;;  %v564_v30 = vunpack.c.l.s4 %v1877_v29  ;;  %v503_v32 = vshrl.u32 %v502_v28, 7  ;;  %vm777_vm2 = vcmask 27648  }
  0x3d   : > { %s1874_s23 = smov 100   ;;  %s1875_s24 = smov 96   ;;  %v501_v31 = vunpack.c.0.s8 %v500_v27 }
  0x3e   : > { %v565_v35 = vunpack.c.0.s8 %v564_v30  ;;  %p351_p1 = scmp.lt.s32.totalorder %s1851_s27, 1 }
  0x3f   : > { %1661 = vmatpush3.bf16.msra.mxu0 %v1748_v9  ;;  %v2036_v36 = vsub.s32 %v501_v31, %v503_v32 }
  0x40   : > { %v2045_v42 = vsub.s32 %v565_v35, %v503_v32  ;;  %s2279_s27 = smov (!%p351_p1, %s1851_s27), 1 }
  0x41   : > { %s2067_s13 = sshll.u32 %s2279_s27, 5 }
  0x42   : > { %s2078_s9 = scalar_lea.vmem %s2263_s5, %s2067_s13  ;;  %s2146_s15 = scalar_lea.vmem %s2264_s6, %s2067_s13 }
  0xc3   : > { %v382_v2 = vpop.xlane.xlu0 %381 }
  0xc4   : > { %v384_v3 = vmul.f32 0.03125, %v382_v2 }
  0xc6   : > { %v385_v4 = vsub.f32 %v376_v0, %v384_v3 }
  0xc8   : > { %v386_v5 = vmul.f32 %v385_v4, %v385_v4 }
  0xca   : > { %v387_v6 = vsel %vm379_vm0, %v386_v5, 0.0 }
  0xcb   : > { %388 = vadd.xlane.f32.xlu0 %v387_v6 }
 0x154   : > { %v389_v10 = vpop.xlane.xlu0 %388 }
 0x155   : > { %v390_v11 = vmul.f32 0.03125, %v389_v10 }
 0x157   : > { %v391_v12 = vadd.f32 1e-05, %v390_v11 }
 0x159   : > { %1749 = vrsqrt.f32 %v391_v12 }
 0x166   : > { %v1750_v13 = vpop.eup %1749 }
 0x167   : > { %v393_v15 = vmul.f32 %v1750_v13, %v385_v4 }
 0x169   : > { %v400_v17 = vmul.f32 %v1620_v14, %v393_v15 }
 0x16b   : > { %v407_v18 = vadd.f32 %v1621_v16, %v400_v17 }
 0x16d   : > { %v408_v19 = vpack.c.bf16 %v407_v18, %v407_v18 }
 0x16f   : > { %1663 = vmatmul.mubr.msk.bf16.vlgmr.msra.gmra.mxu0 %vm379_vm0, %v408_v19 }
 0x22f   : > { %v469_v21 = vpop.f32.mrf.mxu0 }
 0x230   : > { %v470_v22 = vadd.f32 %v1622_v20, %v469_v21 }
 0x231   : > { %v1664_v23 = vpop.f32.mrf.mxu0 }
 0x232   : > { %482 = vrot.lane.b32.xlu0 %v470_v22, %s1867_s17  ;;  %476 = vrot.lane.b32.xlu1 %v470_v22, %s1868_s18  ;;  %s2210_s18 = scalar_lea.vmem %s2265_s7, %s2067_s13 }
 0x233   : > { %v472_v24 = vpop.f32.mrf.mxu0 }
 0x235   : > { %v1665_v25 = vpop.f32.mrf.mxu0 }
 0x236   : > { %1098 = vrot.lane.b32.xlu0 %v470_v22, %s1869_s19  ;;  %479 = vrot.lane.b32.xlu1 %v470_v22, %s1870_s20 }
 0x23a   : > { %485 = vrot.lane.b32.xlu1 %v470_v22, %s1871_s21 }
 0x23e   : > { %488 = vrot.lane.b32.xlu1 %v470_v22, %s1872_s11 }
 0x242   : > { %491 = vrot.lane.b32.xlu1 %v470_v22, %s1873_s22 }
 0x246   : > { %494 = vrot.lane.b32.xlu1 %v470_v22, %s1874_s23 }
 0x24a   : > { %786 = vrot.lane.b32.xlu1 %v470_v22, %s1875_s24 }
 0x2a4   : > { %v2030_v33 = vpop.permute.xlu0 %482  ;;  %v2032_v34 = vpop.permute.xlu1 %476 }
 0x2a5   : > { %788 = vrot.lane.b32.xlu1 %v2032_v34, %s1875_s24  ;;  %v513_v37 = vcombine.low %v2032_v34, %v2030_v33  ;;  %v514_v38 = vcombine.high %v2032_v34, %v2030_v33 }
 0x2a7   : > { %v521_v43 = vrot.slane %v513_v37, %v2036_v36  ;;  %v528_v44 = vrot.slane %v514_v38, %v2036_v36 }
 0x2a8   : > { %v480_v39 = vpop.permute.xlu1 %479 }
 0x2a9   : > { %v497_v40 = vcombine.low %v470_v22, %v480_v39  ;;  %v498_v41 = vcombine.high %v470_v22, %v480_v39  ;;  %792 = vrot.lane.b32.xlu1 %v2030_v33, %s1875_s24  ;;  %790 = vrot.lane.b32.xlu0 %v480_v39, %s1875_s24 }
 0x2ab   : > { %v505_v45 = vrot.slane %v497_v40, %v2036_v36  ;;  %v512_v46 = vrot.slane %v498_v41, %v2036_v36 }
 0x2ac   : > { %v486_v47 = vpop.permute.xlu1 %485 }
 0x2ad   : > { %v561_v48 = vcombine.low %v505_v45, %v521_v43  ;;  %v562_v49 = vcombine.high %v505_v45, %v521_v43  ;;  %v577_v50 = vcombine.low %v512_v46, %v528_v44  ;;  %v578_v51 = vcombine.high %v512_v46, %v528_v44  ;;  %794 = vrot.lane.b32.xlu0 %v486_v47, %s1875_s24 }
 0x2af   : > { %v569_v52 = vrot.slane %v561_v48, %v2045_v42  ;;  %v576_v53 = vrot.slane %v562_v49, %v2045_v42  ;;  %v585_v54 = vrot.slane %v577_v50, %v2045_v42  ;;  %v592_v55 = vrot.slane %v578_v51, %v2045_v42 }
 0x2b0   : > { %v2057_v56 = vpop.permute.xlu1 %488 }
 0x2b1   : > { %v1626_v57 = vcombine.low %v569_v52, %v576_v53  ;;  %v1628_v58 = vcombine.high %v569_v52, %v576_v53  ;;  %v1630_v59 = vcombine.low %v585_v54, %v592_v55  ;;  %v1632_v60 = vcombine.high %v585_v54, %v592_v55  ;;  %796 = vrot.lane.b32.xlu1 %v2057_v56, %s1875_s24 }
 0x2b3   : > { %v641_v61 = vrot.slane %v1626_v57, %v2036_v36  ;;  %v657_v62 = vrot.slane %v1628_v58, %v2036_v36  ;;  %v673_v63 = vrot.slane %v1630_v59, %v2036_v36  ;;  %v689_v0 = vrot.slane %v1632_v60, %v2036_v36 }
 0x2b4   : > { %v492_v1 = vpop.permute.xlu1 %491 }
 0x2b5   : > { %v697_v2 = vcombine.low %v641_v61, %v657_v62  ;;  %v698_v3 = vcombine.high %v641_v61, %v657_v62  ;;  %v729_v4 = vcombine.low %v673_v63, %v689_v0  ;;  %v730_v5 = vcombine.high %v673_v63, %v689_v0  ;;  %798 = vrot.lane.b32.xlu0 %v492_v1, %s1875_s24  ;;  %v2124_v62 = vpop.permute.xlu0 %1098 }
 0x2b6   : > { %v529_v10 = vcombine.low %v486_v47, %v492_v1  ;;  %v530_v11 = vcombine.high %v486_v47, %v492_v1 }
 0x2b7   : > { %v705_v6 = vrot.slane %v697_v2, %v2045_v42  ;;  %v712_v7 = vrot.slane %v698_v3, %v2045_v42  ;;  %v737_v8 = vrot.slane %v729_v4, %v2045_v42  ;;  %v744_v9 = vrot.slane %v730_v5, %v2045_v42 }
 0x2b8   : > { %v495_v12 = vpop.permute.xlu1 %494  ;;  %v537_v23 = vrot.slane %v529_v10, %v2036_v36  ;;  %v544_v24 = vrot.slane %v530_v11, %v2036_v36 }
 0x2b9   : > { %v761_v13 = vcombine.low %v705_v6, %v737_v8  ;;  %v762_v14 = vcombine.high %v705_v6, %v737_v8  ;;  %v763_v15 = vcombine.low %v712_v7, %v744_v9  ;;  %v764_v16 = vcombine.high %v712_v7, %v744_v9  ;;  %1102 = vrot.lane.b32.xlu0 %v480_v39, %s1869_s19 }
 0x2ba   : > { %v545_v17 = vcombine.low %v2057_v56, %v495_v12  ;;  %v546_v18 = vcombine.high %v2057_v56, %v495_v12  ;;  %800 = vrot.lane.b32.xlu1 %v495_v12, %s1875_s24 }
 0x2bb   : > { %v769_v19 = vpack.c.bf16 %v761_v13, %v761_v13  ;;  %v770_v20 = vpack.c.bf16 %v762_v14, %v762_v14  ;;  %v771_v21 = vpack.c.bf16 %v763_v15, %v763_v15  ;;  %v772_v22 = vpack.c.bf16 %v764_v16, %v764_v16 }
 0x2bc   : > { %v553_v25 = vrot.slane %v545_v17, %v2036_v36  ;;  %v560_v26 = vrot.slane %v546_v18, %v2036_v36  ;;  %v787_v61 = vpop.permute.xlu1 %786 }
 0x2bd   : > { %778 = vst.msk [vmem:[%s2078_s9] sm:$0xf] %vm777_vm2, %v769_v19  ;;  %779 = vst.msk [vmem:[%s2078_s9 + $0x4] sm:$0xf] %vm777_vm2, %v770_v20  ;;  %1106 = vrot.lane.b32.xlu0 %v486_v47, %s1869_s19 }
 0x2be   : > { %780 = vst.msk [vmem:[%s2078_s9 + $0x8] sm:$0xf] %vm777_vm2, %v771_v21  ;;  %781 = vst.msk [vmem:[%s2078_s9 + $0xc] sm:$0xf] %vm777_vm2, %v772_v22  ;;  %v593_v27 = vcombine.low %v537_v23, %v553_v25  ;;  %v594_v28 = vcombine.high %v537_v23, %v553_v25  ;;  %v609_v29 = vcombine.low %v544_v24, %v560_v26  ;;  %1100 = vrot.lane.b32.xlu1 %v2032_v34, %s1869_s19 }
 0x2bf   : > { %v610_v30 = vcombine.high %v544_v24, %v560_v26 }
 0x2c0   : > { %v601_v31 = vrot.slane %v593_v27, %v2045_v42  ;;  %v608_v32 = vrot.slane %v594_v28, %v2045_v42  ;;  %v617_v35 = vrot.slane %v609_v29, %v2045_v42 }
 0x2c1   : > { %v624_v37 = vrot.slane %v610_v30, %v2045_v42  ;;  %1110 = vrot.lane.b32.xlu0 %v492_v1, %s1869_s19 }
 0x2c2   : > { %v1627_v38 = vcombine.low %v601_v31, %v608_v32  ;;  %v1629_v39 = vcombine.high %v601_v31, %v608_v32  ;;  %1104 = vrot.lane.b32.xlu1 %v2030_v33, %s1869_s19 }
 0x2c3   : > { %v1631_v40 = vcombine.low %v617_v35, %v624_v37  ;;  %v1633_v41 = vcombine.high %v617_v35, %v624_v37 }
 0x2c4   : > { %v648_v43 = vrot.slane %v1627_v38, %v2036_v36  ;;  %v664_v34 = vrot.slane %v1629_v39, %v2036_v36 }
 0x2c5   : > { %v680_v44 = vrot.slane %v1631_v40, %v2036_v36  ;;  %v696_v45 = vrot.slane %v1633_v41, %v2036_v36 }
 0x2c6   : > { %v713_v46 = vcombine.low %v648_v43, %v664_v34  ;;  %v714_v47 = vcombine.high %v648_v43, %v664_v34  ;;  %1108 = vrot.lane.b32.xlu1 %v2057_v56, %s1869_s19 }
 0x2c7   : > { %v745_v48 = vcombine.low %v680_v44, %v696_v45  ;;  %v746_v49 = vcombine.high %v680_v44, %v696_v45 }
 0x2c8   : > { %v721_v33 = vrot.slane %v713_v46, %v2045_v42  ;;  %v728_v50 = vrot.slane %v714_v47, %v2045_v42 }
 0x2c9   : > { %v753_v51 = vrot.slane %v745_v48, %v2045_v42  ;;  %v760_v52 = vrot.slane %v746_v49, %v2045_v42 }
 0x2ca   : > { %1112 = vrot.lane.b32.xlu1 %v495_v12, %s1869_s19 }
 0x2cb   : > { %v765_v53 = vcombine.low %v721_v33, %v753_v51  ;;  %v766_v54 = vcombine.high %v721_v33, %v753_v51  ;;  %v767_v55 = vcombine.low %v728_v50, %v760_v52  ;;  %v768_v57 = vcombine.high %v728_v50, %v760_v52 }
 0x2cd   : > { %v773_v58 = vpack.c.bf16 %v765_v53, %v765_v53  ;;  %v774_v59 = vpack.c.bf16 %v766_v54, %v766_v54  ;;  %v775_v60 = vpack.c.bf16 %v767_v55, %v767_v55  ;;  %v776_v56 = vpack.c.bf16 %v768_v57, %v768_v57 }
 0x2cf   : > { %782 = vst.msk [vmem:[%s2078_s9 + $0x10] sm:$0xf] %vm777_vm2, %v773_v58  ;;  %783 = vst.msk [vmem:[%s2078_s9 + $0x14] sm:$0xf] %vm777_vm2, %v774_v59 }
 0x2d0   : > { %784 = vst.msk [vmem:[%s2078_s9 + $0x18] sm:$0xf] %vm777_vm2, %v775_v60  ;;  %785 = vst.msk [vmem:[%s2078_s9 + $0x1c] sm:$0xf] %vm777_vm2, %v776_v56 }
 0x317   : > { %v789_v63 = vpop.permute.xlu1 %788 }
 0x31b   : > { %v791_v0 = vpop.permute.xlu0 %790  ;;  %v793_v1 = vpop.permute.xlu1 %792 }
 0x31c   : > { %v810_v2 = vcombine.low %v787_v61, %v791_v0  ;;  %v811_v3 = vcombine.high %v787_v61, %v791_v0  ;;  %v826_v4 = vcombine.low %v789_v63, %v793_v1  ;;  %v827_v5 = vcombine.high %v789_v63, %v793_v1 }
 0x31e   : > { %v818_v6 = vrot.slane %v810_v2, %v2036_v36  ;;  %v825_v7 = vrot.slane %v811_v3, %v2036_v36  ;;  %v834_v8 = vrot.slane %v826_v4, %v2036_v36  ;;  %v841_v9 = vrot.slane %v827_v5, %v2036_v36 }
 0x31f   : > { %v795_v18 = vpop.permute.xlu0 %794 }
 0x320   : > { %v874_v10 = vcombine.low %v818_v6, %v834_v8  ;;  %v875_v11 = vcombine.high %v818_v6, %v834_v8  ;;  %v890_v12 = vcombine.low %v825_v7, %v841_v9  ;;  %v891_v13 = vcombine.high %v825_v7, %v841_v9 }
 0x322   : > { %v882_v14 = vrot.slane %v874_v10, %v2045_v42  ;;  %v889_v15 = vrot.slane %v875_v11, %v2045_v42  ;;  %v898_v16 = vrot.slane %v890_v12, %v2045_v42  ;;  %v905_v17 = vrot.slane %v891_v13, %v2045_v42 }
 0x323   : > { %v797_v32 = vpop.permute.xlu1 %796 }
 0x324   : > { %v1634_v19 = vcombine.low %v882_v14, %v889_v15  ;;  %v1636_v20 = vcombine.high %v882_v14, %v889_v15  ;;  %v1638_v21 = vcombine.low %v898_v16, %v905_v17  ;;  %v1640_v22 = vcombine.high %v898_v16, %v905_v17 }
 0x326   : > { %v954_v23 = vrot.slane %v1634_v19, %v2036_v36  ;;  %v970_v24 = vrot.slane %v1636_v20, %v2036_v36  ;;  %v986_v25 = vrot.slane %v1638_v21, %v2036_v36  ;;  %v1002_v26 = vrot.slane %v1640_v22, %v2036_v36 }
 0x327   : > { %v799_v27 = vpop.permute.xlu0 %798 }
 0x328   : > { %v1010_v28 = vcombine.low %v954_v23, %v970_v24  ;;  %v1011_v29 = vcombine.high %v954_v23, %v970_v24  ;;  %v1042_v30 = vcombine.low %v986_v25, %v1002_v26  ;;  %v1043_v31 = vcombine.high %v986_v25, %v1002_v26 }
 0x329   : > { %v842_v40 = vcombine.low %v795_v18, %v799_v27  ;;  %v843_v41 = vcombine.high %v795_v18, %v799_v27 }
 0x32a   : > { %v1018_v35 = vrot.slane %v1010_v28, %v2045_v42  ;;  %v1025_v37 = vrot.slane %v1011_v29, %v2045_v42  ;;  %v1050_v38 = vrot.slane %v1042_v30, %v2045_v42  ;;  %v1057_v39 = vrot.slane %v1043_v31, %v2045_v42 }
 0x32b   : > { %v1103_v43 = vpop.permute.xlu0 %1102  ;;  %v850_v53 = vrot.slane %v842_v40, %v2036_v36  ;;  %v857_v54 = vrot.slane %v843_v41, %v2036_v36 }
 0x32c   : > { %v1074_v34 = vcombine.low %v1018_v35, %v1050_v38  ;;  %v1075_v44 = vcombine.high %v1018_v35, %v1050_v38  ;;  %v1076_v45 = vcombine.low %v1025_v37, %v1057_v39  ;;  %v1077_v46 = vcombine.high %v1025_v37, %v1057_v39  ;;  %v801_v47 = vpop.permute.xlu1 %800 }
 0x32d   : > { %v858_v48 = vcombine.low %v797_v32, %v801_v47  ;;  %v859_v49 = vcombine.high %v797_v32, %v801_v47  ;;  %v1122_v0 = vcombine.low %v2124_v62, %v1103_v43  ;;  %v1123_v1 = vcombine.high %v2124_v62, %v1103_v43 }
 0x32e   : > { %v1082_v33 = vpack.c.bf16 %v1074_v34, %v1074_v34  ;;  %v1083_v50 = vpack.c.bf16 %v1075_v44, %v1075_v44  ;;  %v1084_v51 = vpack.c.bf16 %v1076_v45, %v1076_v45  ;;  %v1085_v52 = vpack.c.bf16 %v1077_v46, %v1077_v46 }
 0x32f   : > { %v866_v55 = vrot.slane %v858_v48, %v2036_v36  ;;  %v873_v57 = vrot.slane %v859_v49, %v2036_v36  ;;  %v2152_v58 = vpop.permute.xlu0 %1106  ;;  %v1130_v12 = vrot.slane %v1122_v0, %v2036_v36  ;;  %v1137_v13 = vrot.slane %v1123_v1, %v2036_v36 }
 0x330   : > { %1090 = vst.msk [vmem:[%s2146_s15] sm:$0xf] %vm777_vm2, %v1082_v33  ;;  %1091 = vst.msk [vmem:[%s2146_s15 + $0x4] sm:$0xf] %vm777_vm2, %v1083_v50  ;;  %v1101_v59 = vpop.permute.xlu1 %1100 }
 0x331   : > { %1092 = vst.msk [vmem:[%s2146_s15 + $0x8] sm:$0xf] %vm777_vm2, %v1084_v51  ;;  %1093 = vst.msk [vmem:[%s2146_s15 + $0xc] sm:$0xf] %vm777_vm2, %v1085_v52  ;;  %v906_v60 = vcombine.low %v850_v53, %v866_v55  ;;  %v907_v56 = vcombine.high %v850_v53, %v866_v55  ;;  %v922_v61 = vcombine.low %v857_v54, %v873_v57 }
 0x332   : > { %v923_v63 = vcombine.high %v857_v54, %v873_v57 }
 0x333   : > { %v914_v2 = vrot.slane %v906_v60, %v2045_v42  ;;  %v921_v3 = vrot.slane %v907_v56, %v2045_v42  ;;  %v930_v4 = vrot.slane %v922_v61, %v2045_v42  ;;  %v1111_v11 = vpop.permute.xlu0 %1110 }
 0x334   : > { %v937_v5 = vrot.slane %v923_v63, %v2045_v42  ;;  %v1105_v6 = vpop.permute.xlu1 %1104  ;;  %v1154_v19 = vcombine.low %v2152_v58, %v1111_v11  ;;  %v1155_v20 = vcombine.high %v2152_v58, %v1111_v11 }
 0x335   : > { %v1635_v7 = vcombine.low %v914_v2, %v921_v3  ;;  %v1637_v8 = vcombine.high %v914_v2, %v921_v3  ;;  %v1138_v14 = vcombine.low %v1101_v59, %v1105_v6  ;;  %v1139_v62 = vcombine.high %v1101_v59, %v1105_v6 }
 0x336   : > { %v1639_v9 = vcombine.low %v930_v4, %v937_v5  ;;  %v1641_v10 = vcombine.high %v930_v4, %v937_v5  ;;  %v1162_v2 = vrot.slane %v1154_v19, %v2036_v36  ;;  %v1169_v3 = vrot.slane %v1155_v20, %v2036_v36 }
 0x337   : > { %v961_v15 = vrot.slane %v1635_v7, %v2036_v36  ;;  %v977_v16 = vrot.slane %v1637_v8, %v2036_v36  ;;  %v1146_v21 = vrot.slane %v1138_v14, %v2036_v36  ;;  %v1153_v22 = vrot.slane %v1139_v62, %v2036_v36 }
 0x338   : > { %v993_v17 = vrot.slane %v1639_v9, %v2036_v36  ;;  %v1009_v18 = vrot.slane %v1641_v10, %v2036_v36  ;;  %v1109_v23 = vpop.permute.xlu1 %1108 }
 0x339   : > { %v1026_v24 = vcombine.low %v961_v15, %v977_v16  ;;  %v1027_v25 = vcombine.high %v961_v15, %v977_v16  ;;  %v1186_v28 = vcombine.low %v1130_v12, %v1146_v21  ;;  %v1187_v29 = vcombine.high %v1130_v12, %v1146_v21 }
 0x33a   : > { %v1058_v26 = vcombine.low %v993_v17, %v1009_v18  ;;  %v1059_v27 = vcombine.high %v993_v17, %v1009_v18  ;;  %v1202_v30 = vcombine.low %v1137_v13, %v1153_v22  ;;  %v1203_v31 = vcombine.high %v1137_v13, %v1153_v22 }
 0x33b   : > { %v1034_v32 = vrot.slane %v1026_v24, %v2045_v42  ;;  %v1041_v35 = vrot.slane %v1027_v25, %v2045_v42  ;;  %v1194_v39 = vrot.slane %v1186_v28, %v2045_v42  ;;  %v1201_v40 = vrot.slane %v1187_v29, %v2045_v42 }
 0x33c   : > { %v1066_v37 = vrot.slane %v1058_v26, %v2045_v42  ;;  %v1073_v38 = vrot.slane %v1059_v27, %v2045_v42  ;;  %v1210_v41 = vrot.slane %v1202_v30, %v2045_v42  ;;  %v1217_v43 = vrot.slane %v1203_v31, %v2045_v42  ;;  %v1113_v50 = vpop.permute.xlu1 %1112 }
 0x33d   : > { %v1642_v47 = vcombine.low %v1194_v39, %v1201_v40  ;;  %v1644_v48 = vcombine.high %v1194_v39, %v1201_v40  ;;  %v1170_v60 = vcombine.low %v1109_v23, %v1113_v50  ;;  %v1171_v56 = vcombine.high %v1109_v23, %v1113_v50 }
 0x33e   : > { %v1078_v34 = vcombine.low %v1034_v32, %v1066_v37  ;;  %v1079_v44 = vcombine.high %v1034_v32, %v1066_v37  ;;  %v1080_v45 = vcombine.low %v1041_v35, %v1073_v38  ;;  %v1081_v46 = vcombine.high %v1041_v35, %v1073_v38 }
 0x33f   : > { %v1646_v49 = vcombine.low %v1210_v41, %v1217_v43  ;;  %v1648_v33 = vcombine.high %v1210_v41, %v1217_v43  ;;  %v1266_v55 = vrot.slane %v1642_v47, %v2036_v36  ;;  %v1282_v57 = vrot.slane %v1644_v48, %v2036_v36 }
 0x340   : > { %v1086_v51 = vpack.c.bf16 %v1078_v34, %v1078_v34  ;;  %v1087_v52 = vpack.c.bf16 %v1079_v44, %v1079_v44  ;;  %v1088_v53 = vpack.c.bf16 %v1080_v45, %v1080_v45  ;;  %v1089_v54 = vpack.c.bf16 %v1081_v46, %v1081_v46 }
 0x341   : > { %v1298_v58 = vrot.slane %v1646_v49, %v2036_v36  ;;  %v1314_v59 = vrot.slane %v1648_v33, %v2036_v36  ;;  %v1322_v61 = vcombine.low %v1266_v55, %v1282_v57  ;;  %v1323_v63 = vcombine.high %v1266_v55, %v1282_v57 }
 0x342   : > { %1094 = vst.msk [vmem:[%s2146_s15 + $0x10] sm:$0xf] %vm777_vm2, %v1086_v51  ;;  %1095 = vst.msk [vmem:[%s2146_s15 + $0x14] sm:$0xf] %vm777_vm2, %v1087_v52  ;;  %v1178_v4 = vrot.slane %v1170_v60, %v2036_v36  ;;  %v1185_v5 = vrot.slane %v1171_v56, %v2036_v36 }
 0x343   : > { %1096 = vst.msk [vmem:[%s2146_s15 + $0x18] sm:$0xf] %vm777_vm2, %v1088_v53  ;;  %1097 = vst.msk [vmem:[%s2146_s15 + $0x1c] sm:$0xf] %vm777_vm2, %v1089_v54  ;;  %v1354_v0 = vcombine.low %v1298_v58, %v1314_v59  ;;  %v1355_v1 = vcombine.high %v1298_v58, %v1314_v59  ;;  %v1330_v6 = vrot.slane %v1322_v61, %v2045_v42 }
 0x344   : > { %v1337_v7 = vrot.slane %v1323_v63, %v2045_v42  ;;  %v1218_v10 = vcombine.low %v1162_v2, %v1178_v4  ;;  %v1219_v11 = vcombine.high %v1162_v2, %v1178_v4  ;;  %v1234_v12 = vcombine.low %v1169_v3, %v1185_v5 }
 0x345   : > { %v1362_v8 = vrot.slane %v1354_v0, %v2045_v42  ;;  %v1369_v9 = vrot.slane %v1355_v1, %v2045_v42  ;;  %v1235_v13 = vcombine.high %v1169_v3, %v1185_v5 }
 0x346   : > { %v1226_v17 = vrot.slane %v1218_v10, %v2045_v42  ;;  %v1233_v18 = vrot.slane %v1219_v11, %v2045_v42  ;;  %v1242_v19 = vrot.slane %v1234_v12, %v2045_v42 }
 0x347   : > { %v1386_v14 = vcombine.low %v1330_v6, %v1362_v8  ;;  %v1387_v62 = vcombine.high %v1330_v6, %v1362_v8  ;;  %v1388_v15 = vcombine.low %v1337_v7, %v1369_v9  ;;  %v1389_v16 = vcombine.high %v1337_v7, %v1369_v9 }
 0x348   : > { %v1249_v20 = vrot.slane %v1235_v13, %v2045_v42  ;;  %v1643_v25 = vcombine.low %v1226_v17, %v1233_v18  ;;  %v1645_v26 = vcombine.high %v1226_v17, %v1233_v18 }
 0x349   : > { %v1394_v21 = vpack.c.bf16 %v1386_v14, %v1386_v14  ;;  %v1395_v22 = vpack.c.bf16 %v1387_v62, %v1387_v62  ;;  %v1396_v23 = vpack.c.bf16 %v1388_v15, %v1388_v15  ;;  %v1397_v24 = vpack.c.bf16 %v1389_v16, %v1389_v16 }
 0x34a   : > { %v1647_v27 = vcombine.low %v1242_v19, %v1249_v20  ;;  %v1649_v28 = vcombine.high %v1242_v19, %v1249_v20  ;;  %v1273_v29 = vrot.slane %v1643_v25, %v2036_v36  ;;  %v1289_v30 = vrot.slane %v1645_v26, %v2036_v36 }
 0x34b   : > { %1402 = vst.msk [vmem:[%s2210_s18] sm:$0xf] %vm777_vm2, %v1394_v21  ;;  %1403 = vst.msk [vmem:[%s2210_s18 + $0x4] sm:$0xf] %vm777_vm2, %v1395_v22 }
 0x34c   : > { %1404 = vst.msk [vmem:[%s2210_s18 + $0x8] sm:$0xf] %vm777_vm2, %v1396_v23  ;;  %1405 = vst.msk [vmem:[%s2210_s18 + $0xc] sm:$0xf] %vm777_vm2, %v1397_v24  ;;  %v1305_v31 = vrot.slane %v1647_v27, %v2036_v36  ;;  %v1321_v32 = vrot.slane %v1649_v28, %v2036_v36  ;;  %v1338_v35 = vcombine.low %v1273_v29, %v1289_v30 }
 0x34d   : > { %v1339_v37 = vcombine.high %v1273_v29, %v1289_v30 }
 0x34e   : > { %v1370_v38 = vcombine.low %v1305_v31, %v1321_v32  ;;  %v1371_v39 = vcombine.high %v1305_v31, %v1321_v32  ;;  %v1346_v40 = vrot.slane %v1338_v35, %v2045_v42 }
 0x34f   : > { %v1353_v41 = vrot.slane %v1339_v37, %v2045_v42 }
 0x350   : > { %v1378_v43 = vrot.slane %v1370_v38, %v2045_v42  ;;  %v1385_v34 = vrot.slane %v1371_v39, %v2045_v42 }
 0x352   : > { %v1390_v44 = vcombine.low %v1346_v40, %v1378_v43  ;;  %v1391_v45 = vcombine.high %v1346_v40, %v1378_v43  ;;  %v1392_v46 = vcombine.low %v1353_v41, %v1385_v34  ;;  %v1393_v36 = vcombine.high %v1353_v41, %v1385_v34 }
 0x354   : > { %v1398_v47 = vpack.c.bf16 %v1390_v44, %v1390_v44  ;;  %v1399_v48 = vpack.c.bf16 %v1391_v45, %v1391_v45  ;;  %v1400_v49 = vpack.c.bf16 %v1392_v46, %v1392_v46  ;;  %v1401_v33 = vpack.c.bf16 %v1393_v36, %v1393_v36 }
 0x356   : > { %1406 = vst.msk [vmem:[%s2210_s18 + $0x10] sm:$0xf] %vm777_vm2, %v1398_v47  ;;  %1407 = vst.msk [vmem:[%s2210_s18 + $0x14] sm:$0xf] %vm777_vm2, %v1399_v48 }
 0x357   : > { %1408 = vst.msk [vmem:[%s2210_s18 + $0x18] sm:$0xf] %vm777_vm2, %v1400_v49  ;;  %1409 = vst.msk [vmem:[%s2210_s18 + $0x1c] sm:$0xf] %vm777_vm2, %v1401_v33 }
 0x358 PF: > { %s22_s29 = sadd.s32 1, %s1859_s29   ;;  %s2271_s24 = smov %s1843_s25 }
 0x359   : > { %p19_p4 = scmp.ge.s32.totalorder %s22_s29, 4   ;;  %s2272_s25 = smov %s1847_s26 }
 0x35a   : > { %s2273_s26 = smov %s1992_s30  ;;  %s2274_s27 = smov %s1855_s28 }
 0x35b   : > { %s2275_s28 = smov %s2277_s14  ;;  %21 = sbr.rel (!%p19_p4) target bundleno = 5 (0x5), region = 108 }
 0x360   :  { %1481 = vsyncpa [#allocation3], 1 }
 0x361   :  { %1483 = vsyncpa [#allocation3 + $0x1], 1 }
 0x362   :  { %1484 = vsyncpa [#allocation5], 1 }

</bundles_post_ra>
